<compile_context>
chip_gen: v7x
topology: tpu7x:2x2x1
jax: 0.10.0
libtpu: 0.0.40
codegen_flags: <defaults>
</compile_context>

<pallas_src>
import functools

import jax
import jax.numpy as jnp
from jax import lax
from jax.experimental import pallas as pl
from jax.experimental.pallas import tpu as pltpu

# ---------------- LIF (norse LIFParameters defaults, feed-forward cell) ----------------
DT = 1e-3
TAU_SYN_INV = 200.0
TAU_MEM_INV = 100.0
V_LEAK = 0.0
V_TH = 1.0
V_RESET = 0.0


def lif_step(inp, v, i):
    """One LIF feed-forward step. Returns (spikes, v_new, i_new)."""
    v_decayed = v + DT * TAU_MEM_INV * ((V_LEAK - v) + i)
    i_decayed = i - DT * TAU_SYN_INV * i
    z = jnp.where(v_decayed - V_TH > 0.0, 1.0, 0.0).astype(jnp.float32)
    v_new = (1.0 - z) * v_decayed + z * V_RESET
    i_new = i_decayed + inp
    return z, v_new, i_new


# ---------------- Pallas kernel: one batch-block of lane-dense rows per grid step ----------------
def basic_block_kernel(H, x_ref, m1_ref, m2_ref, bias_ref, st_ref, out_ref, stout_ref):
    M, WC = x_ref.shape                       # M = B_tile * H rows, WC = W*C lanes

    x = x_ref[...]                            # f32; reused as the identity branch

    # Row-edge masks, computed ONCE and reused by both convs.  (row % H) zeroes the
    # roll wraparound at image boundaries even with batch folded into the M dim.
    row = lax.broadcasted_iota(jnp.int32, (M, WC), 0) % H
    mask_up = row >= 1                        # first image row has no h-1 neighbour
    mask_dn = row < H - 1                     # last image row has no h+1 neighbour

    def conv3x3(a, m_ref):
        # a[h-1], a[h], a[h+1] via sublane rolls (XLU) + edge masks, concatenated
        # along lanes into one (M, 3*WC) LHS -> a single MXU matmul with K = 3*WC.
        a_up = jnp.where(mask_up, pltpu.roll(a, shift=1, axis=0), 0.0)
        a_dn = jnp.where(mask_dn, pltpu.roll(a, shift=M - 1, axis=0), 0.0)
        lhs = jnp.concatenate([a_up, a, a_dn], axis=1).astype(jnp.bfloat16)
        return jnp.dot(lhs, m_ref[...], preferred_element_type=jnp.float32)

    bn = bias_ref[...]                        # (2, WC)
    b1, b2 = bn[0:1], bn[1:2]                 # (1, WC) each, broadcast over rows

    # ---- conv1 -> bn1 (scale folded into weights) -> lif1 ----
    y1 = conv3x3(x, m1_ref) + b1
    z1, v1n, i1n = lif_step(y1, st_ref[0], st_ref[1])

    # ---- conv2 -> bn2 -> +identity -> lif2 ----
    y2 = conv3x3(z1, m2_ref) + b2 + x         # identity = x (stride=1, no downsample)
    z2, v2n, i2n = lif_step(y2, st_ref[2], st_ref[3])

    out_ref[...] = z2
    stout_ref[0] = v1n
    stout_ref[1] = i1n
    stout_ref[2] = v2n
    stout_ref[3] = i2n


# ---------------- one-time parameter prep (hoisted off the per-timestep path) ----------------
def _banded_weight(w_oihw, W, out_scale):
    """(Cout, Cin, 3, 3) OIHW conv weights -> a single (3*W*Cin, W*Cout) bf16 block-banded
    matrix (row-tap kh major), with the per-output-channel BN scale folded into the columns:
      M[kh*W*Cin + w_in*Cin + ci, w_out*Cout + co]
        = scale[co] * W[co, ci, kh, (w_in - w_out) + 1]   if |w_in - w_out| <= 1, else 0.
    """
    Cout, Cin = w_oihw.shape[0], w_oihw.shape[1]
    w_t = jnp.transpose(w_oihw, (2, 3, 1, 0)).astype(jnp.float32)   # (kh, kw, Cin, Cout)
    dw = jnp.arange(W)[:, None] - jnp.arange(W)[None, :]            # w_in - w_out
    valid = (jnp.abs(dw) <= 1).astype(jnp.float32)
    kw_idx = jnp.clip(dw + 1, 0, 2)
    band = w_t[:, kw_idx, :, :] * valid[None, :, :, None, None]     # (3, W_in, W_out, Cin, Cout)
    m = jnp.transpose(band, (0, 1, 3, 2, 4)).reshape(3, W * Cin, W * Cout)
    m = m * jnp.tile(out_scale, W)[None, None, :]                   # fold BN scale per out channel
    return m.reshape(3 * W * Cin, W * Cout).astype(jnp.bfloat16)


def prepare_basic_block_params(params, W):
    """Run ONCE per parameter set (constant across spiking timesteps)."""
    eps = 1e-5
    inv1 = params["gamma1"] / jnp.sqrt(params["var1"] + eps)
    inv2 = params["gamma2"] / jnp.sqrt(params["var2"] + eps)
    m1 = _banded_weight(params["w1"], W, inv1)                      # bf16, BN-scaled
    m2 = _banded_weight(params["w2"], W, inv2)
    bias = jnp.stack([jnp.tile(params["beta1"] - params["mean1"] * inv1, W),
                      jnp.tile(params["beta2"] - params["mean2"] * inv2, W)],
                     axis=0).astype(jnp.float32)                    # (2, W*C)
    return m1, m2, bias


# ---------------- per-timestep step (lane-dense in / lane-dense out) ----------------
@functools.partial(jax.jit, static_argnames=("H",), donate_argnums=(0, 1))
def basic_block_step_ld(x_ld, st_in, m1, m2, bias, *, H):
    """x_ld: (N*H, W*C) f32 lane-dense activations.
    st_in: (4, N*H, W*C) f32 packed LIF state (v1, i1, v2, i2) -- updated in place.
    Returns (spikes (N*H, W*C), new packed state (4, N*H, W*C))."""
    NH, WC = x_ld.shape
    N = NH // H

    # One grid block over the whole batch at toy sizes (M = N*H matmul rows, one
    # 0.35us grid step).  Split into 2 blocks only when each block keeps >= 256 rows
    # (v7x two-TC case).  # TODO(synk): weight-column tiling for real channel counts.
    n_blocks = 2 if (N % 2 == 0 and (NH // 2) >= 256) else 1
    MB = NH // n_blocks                                       # rows per block (multiple of H)

    grid_spec = pltpu.PrefetchScalarGridSpec(
        num_scalar_prefetch=0,
        grid=(n_blocks,),
        in_specs=[
            pl.BlockSpec((MB, WC), lambda n: (n, 0)),          # x (lane-dense rows)
            pl.BlockSpec((3 * WC, WC), lambda n: (0, 0)),      # conv1 banded weights (bf16)
            pl.BlockSpec((3 * WC, WC), lambda n: (0, 0)),      # conv2 banded weights (bf16)
            pl.BlockSpec((2, WC), lambda n: (0, 0)),           # BN biases
            pl.BlockSpec((4, MB, WC), lambda n: (0, n, 0)),    # packed LIF state in
        ],
        out_specs=[
            pl.BlockSpec((MB, WC), lambda n: (n, 0)),          # spikes
            pl.BlockSpec((4, MB, WC), lambda n: (0, n, 0)),    # packed LIF state out
        ],
    )
    out_shape = (jax.ShapeDtypeStruct((NH, WC), jnp.float32),
                 jax.ShapeDtypeStruct((4, NH, WC), jnp.float32))

    return pl.pallas_call(
        functools.partial(basic_block_kernel, H),
        grid_spec=grid_spec,
        out_shape=out_shape,
        input_output_aliases={0: 0, 4: 1},                     # x -> spikes, state in-place
        compiler_params=pltpu.CompilerParams(
            dimension_semantics=("parallel",)),
    )(x_ld, m1, m2, bias, st_in)


def init_lif_state_ld(NH, WC):
    """Packed zero LIF state (the `state is None` path of the original module)."""
    return jnp.zeros((4, NH, WC), jnp.float32)


# ---------------- layout glue (only needed at the NCHW boundary, not per timestep) ----------------
def nchw_to_ld(a):
    """NCHW -> lane-dense rows (N*H, W*C)."""
    N, C, H, W = a.shape
    return jnp.transpose(a, (0, 2, 3, 1)).astype(jnp.float32).reshape(N * H, W * C)


def ld_to_nchw(a, N, C):
    NH, WC = a.shape
    H, W = NH // N, WC // C
    return jnp.transpose(a.reshape(N, H, W, C), (0, 3, 1, 2))


# ---------------- pure-JAX reference ----------------
def reference_forward(x, state, params):
    eps = 1e-5
    nchw2nhwc = lambda a: jnp.transpose(a, (0, 2, 3, 1)).astype(jnp.float32)
    nhwc2nchw = lambda a: jnp.transpose(a, (0, 3, 1, 2))

    def conv(y, w_oihw):
        return lax.conv_general_dilated(
            y, jnp.transpose(w_oihw, (2, 3, 1, 0)),
            window_strides=(1, 1), padding=((1, 1), (1, 1)),
            dimension_numbers=("NHWC", "HWIO", "NHWC"))

    def bn(y, g, b, m, v):
        return (y - m) / jnp.sqrt(v + eps) * g + b

    x_nhwc = nchw2nhwc(x)
    v1, i1 = nchw2nhwc(state[0][0]), nchw2nhwc(state[0][1])
    v2, i2 = nchw2nhwc(state[1][0]), nchw2nhwc(state[1][1])

    y1 = bn(conv(x_nhwc, params["w1"]), params["gamma1"], params["beta1"],
            params["mean1"], params["var1"])
    z1, v1n, i1n = lif_step(y1, v1, i1)
    y2 = bn(conv(z1, params["w2"]), params["gamma2"], params["beta2"],
            params["mean2"], params["var2"]) + x_nhwc
    z2, v2n, i2n = lif_step(y2, v2, i2)
    return nhwc2nchw(z2), ((nhwc2nchw(v1n), nhwc2nchw(i1n)),
                           (nhwc2nchw(v2n), nhwc2nchw(i2n)))


if __name__ == "__main__":
    key = jax.random.PRNGKey(0)
    ks = jax.random.split(key, 16)
    # inplanes = planes = 8 (no downsample), 16x16 feature map -> W*C = 128 lanes;
    # batch 8 -> matmul M dimension = N*H = 128 rows (full MXU height on v5e).
    N, C, H, W = 8, 8, 16, 16

    x = jax.random.normal(ks[0], (N, C, H, W), jnp.float32)

    params = {
        "w1": 0.2 * jax.random.normal(ks[1], (C, C, 3, 3), jnp.float32),
        "w2": 0.2 * jax.random.normal(ks[2], (C, C, 3, 3), jnp.float32),
        "gamma1": 1.0 + 0.1 * jax.random.normal(ks[3], (C,), jnp.float32),
        "beta1": 0.1 * jax.random.normal(ks[4], (C,), jnp.float32),
        "mean1": 0.1 * jax.random.normal(ks[5], (C,), jnp.float32),
        "var1": 1.0 + 0.2 * jax.random.uniform(ks[6], (C,), jnp.float32),
        "gamma2": 1.0 + 0.1 * jax.random.normal(ks[7], (C,), jnp.float32),
        "beta2": 0.1 * jax.random.normal(ks[8], (C,), jnp.float32),
        "mean2": 0.1 * jax.random.normal(ks[9], (C,), jnp.float32),
        "var2": 1.0 + 0.2 * jax.random.uniform(ks[10], (C,), jnp.float32),
    }

    # Non-trivial LIF states so some neurons actually spike on this step.
    state = (
        (jax.random.uniform(ks[11], (N, C, H, W), minval=0.0, maxval=1.5),
         jax.random.uniform(ks[12], (N, C, H, W), minval=0.0, maxval=1.0)),
        (jax.random.uniform(ks[13], (N, C, H, W), minval=0.0, maxval=1.5),
         jax.random.uniform(ks[14], (N, C, H, W), minval=0.0, maxval=1.0)),
    )

    # ---- once-per-parameter-set prep (NOT on the per-timestep path) ----
    m1, m2, bias = prepare_basic_block_params(params, W)

    # ---- persistent lane-dense activations + packed LIF state (donated / updated in place) ----
    x_ld = nchw_to_ld(x)
    st_in = jnp.stack([nchw_to_ld(state[0][0]), nchw_to_ld(state[0][1]),
                       nchw_to_ld(state[1][0]), nchw_to_ld(state[1][1])], axis=0)

    out_ld, st_out = basic_block_step_ld(x_ld, st_in, m1, m2, bias, H=H)
    jax.block_until_ready((out_ld, st_out))

    # ---- correctness vs pure-JAX f32 reference ----
    out_r, st_r = reference_forward(x, state, params)
    out = ld_to_nchw(out_ld, N, C)
    v1n, i1n = ld_to_nchw(st_out[0], N, C), ld_to_nchw(st_out[1], N, C)
    v2n, i2n = ld_to_nchw(st_out[2], N, C), ld_to_nchw(st_out[3], N, C)

    # Spikes and membrane voltages do not depend on this step's conv output, so they
    # match tightly; synaptic currents carry the bf16-matmul rounding (looser tol).
    ok = bool(jnp.allclose(out, out_r, atol=1e-4, rtol=1e-4))
    ok &= bool(jnp.allclose(v1n, st_r[0][0], atol=1e-4, rtol=1e-4))
    ok &= bool(jnp.allclose(v2n, st_r[1][0], atol=1e-4, rtol=1e-4))
    ok &= bool(jnp.allclose(i1n, st_r[0][1], atol=3e-2, rtol=3e-2))
    ok &= bool(jnp.allclose(i2n, st_r[1][1], atol=3e-2, rtol=3e-2))

    if ok:
        print("KERNEL_OK")
    else:
        raise SystemExit("mismatch vs pure-JAX reference")
</pallas_src>

<mosaic_0001>
module attributes {stable_mosaic.version = 11 : i64} {
  func.func @basic_block_kernel(%arg0: i32, %arg1: memref<128x128xf32, #tpu.memory_space<vmem>>, %arg2: memref<384x128xbf16, #tpu.memory_space<vmem>>, %arg3: memref<384x128xbf16, #tpu.memory_space<vmem>>, %arg4: memref<2x128xf32, #tpu.memory_space<vmem>>, %arg5: memref<4x128x128xf32, #tpu.memory_space<vmem>>, %arg6: memref<128x128xf32, #tpu.memory_space<vmem>>, %arg7: memref<4x128x128xf32, #tpu.memory_space<vmem>>) attributes {dimension_semantics = [#tpu.dimension_semantics<parallel>], iteration_bounds = array<i64: 1>, scalar_prefetch = 0 : i64, scratch_operands = 0 : i64, tpu.core_type = #tpu.core_type<tc>, window_params = [{transform_indices = @transform_0, window_bounds = array<i64: 128, 128>}, {pipeline_mode = #tpu.pipeline_mode<synchronous>, transform_indices = @transform_1, window_bounds = array<i64: 384, 128>}, {pipeline_mode = #tpu.pipeline_mode<synchronous>, transform_indices = @transform_2, window_bounds = array<i64: 384, 128>}, {pipeline_mode = #tpu.pipeline_mode<synchronous>, transform_indices = @transform_3, window_bounds = array<i64: 2, 128>}, {transform_indices = @transform_4, window_bounds = array<i64: 4, 128, 128>}, {transform_indices = @transform_5, window_bounds = array<i64: 128, 128>}, {transform_indices = @transform_6, window_bounds = array<i64: 4, 128, 128>}]} {
    %c0 = arith.constant 0 : index
    %c0_0 = arith.constant 0 : index
    %0 = vector.load %arg1[%c0, %c0_0] : memref<128x128xf32, #tpu.memory_space<vmem>>, vector<128x128xf32>
    %1 = tpu.iota {dimensions = array<i32: 0>} : vector<128x128xi32>
    %c16_i32 = arith.constant 16 : i32
    %c0_i32 = arith.constant 0 : i32
    %2 = arith.cmpi eq, %c16_i32, %c0_i32 : i32
    %c1_i32 = arith.constant 1 : i32
    %3 = arith.select %2, %c1_i32, %c16_i32 : i32
    %4 = vector.broadcast %3 : i32 to vector<128x128xi32>
    %5 = arith.remsi %1, %4 : vector<128x128xi32>
    %c0_i32_1 = arith.constant 0 : i32
    %6 = vector.broadcast %c0_i32_1 : i32 to vector<128x128xi32>
    %7 = arith.cmpi ne, %5, %6 : vector<128x128xi32>
    %c0_i32_2 = arith.constant 0 : i32
    %8 = vector.broadcast %c0_i32_2 : i32 to vector<128x128xi32>
    %9 = arith.cmpi slt, %5, %8 : vector<128x128xi32>
    %c0_i32_3 = arith.constant 0 : i32
    %10 = arith.cmpi slt, %3, %c0_i32_3 : i32
    %11 = vector.broadcast %10 : i1 to vector<128x128xi1>
    %12 = vector.broadcast %11 : vector<128x128xi1> to vector<128x128xi1>
    %13 = arith.xori %9, %12 : vector<128x128xi1>
    %14 = arith.andi %13, %7 : vector<128x128xi1>
    %15 = vector.broadcast %3 : i32 to vector<128x128xi32>
    %16 = arith.addi %5, %15 : vector<128x128xi32>
    %17 = arith.select %14, %16, %5 : vector<128x128xi1>, vector<128x128xi32>
    %c1_i32_4 = arith.constant 1 : i32
    %18 = vector.broadcast %c1_i32_4 : i32 to vector<128x128xi32>
    %19 = arith.cmpi sge, %17, %18 : vector<128x128xi32>
    %c15_i32 = arith.constant 15 : i32
    %20 = vector.broadcast %c15_i32 : i32 to vector<128x128xi32>
    %21 = arith.cmpi slt, %17, %20 : vector<128x128xi32>
    %c0_5 = arith.constant 0 : index
    %c0_6 = arith.constant 0 : index
    %22 = vector.load %arg4[%c0_5, %c0_6] : memref<2x128xf32, #tpu.memory_space<vmem>>, vector<2x128xf32>
    %23 = vector.extract_strided_slice %22 {offsets = [0, 0], sizes = [1, 128], strides = [1, 1]} : vector<2x128xf32> to vector<1x128xf32>
    %24 = vector.extract_strided_slice %22 {offsets = [1, 0], sizes = [1, 128], strides = [1, 1]} : vector<2x128xf32> to vector<1x128xf32>
    %c1_i32_7 = arith.constant 1 : i32
    %25 = tpu.dynamic_rotate %0 by %c1_i32_7 dim 0 : vector<128x128xf32>, i32 -> vector<128x128xf32>
    %cst = arith.constant 0.000000e+00 : f32
    %26 = vector.broadcast %cst : f32 to vector<128x128xf32>
    %27 = arith.select %19, %25, %26 : vector<128x128xi1>, vector<128x128xf32>
    %c127_i32 = arith.constant 127 : i32
    %28 = tpu.dynamic_rotate %0 by %c127_i32 dim 0 : vector<128x128xf32>, i32 -> vector<128x128xf32>
    %cst_8 = arith.constant 0.000000e+00 : f32
    %29 = vector.broadcast %cst_8 : f32 to vector<128x128xf32>
    %30 = arith.select %21, %28, %29 : vector<128x128xi1>, vector<128x128xf32>
    %31 = tpu.concatenate %27, %0, %30 in 1 : vector<128x128xf32>, vector<128x128xf32>, vector<128x128xf32> -> vector<128x384xf32>
    %32 = arith.truncf %31 : vector<128x384xf32> to vector<128x384xbf16>
    %c0_9 = arith.constant 0 : index
    %c0_10 = arith.constant 0 : index
    %33 = vector.load %arg2[%c0_9, %c0_10] : memref<384x128xbf16, #tpu.memory_space<vmem>>, vector<384x128xbf16>
    %cst_11 = arith.constant dense<0.000000e+00> : vector<128x128xf32>
    %34 = tpu.matmul %32, %33, %cst_11 {dimension_numbers = #tpu.dot_dimension_numbers<[1], [0], [0], [1], [0, 0, 1, 1], [], []>} : vector<128x384xbf16>, vector<384x128xbf16>, vector<128x128xf32> -> vector<128x128xf32>
    %35 = vector.broadcast %23 : vector<1x128xf32> to vector<128x128xf32>
    %36 = arith.addf %34, %35 : vector<128x128xf32>
    %c0_12 = arith.constant 0 : index
    %c0_13 = arith.constant 0 : index
    %c0_14 = arith.constant 0 : index
    %37 = vector.load %arg5[%c0_12, %c0_13, %c0_14] : memref<4x128x128xf32, #tpu.memory_space<vmem>>, vector<1x128x128xf32>
    %38 = vector.shape_cast %37 : vector<1x128x128xf32> to vector<128x128xf32>
    %c1 = arith.constant 1 : index
    %c0_15 = arith.constant 0 : index
    %c0_16 = arith.constant 0 : index
    %39 = vector.load %arg5[%c1, %c0_15, %c0_16] : memref<4x128x128xf32, #tpu.memory_space<vmem>>, vector<1x128x128xf32>
    %40 = vector.shape_cast %39 : vector<1x128x128xf32> to vector<128x128xf32>
    %cst_17 = arith.constant 0.000000e+00 : f32
    %41 = vector.broadcast %cst_17 : f32 to vector<128x128xf32>
    %42 = arith.subf %41, %38 : vector<128x128xf32>
    %43 = arith.addf %42, %40 : vector<128x128xf32>
    %cst_18 = arith.constant 1.000000e-01 : f32
    %44 = vector.broadcast %cst_18 : f32 to vector<128x128xf32>
    %45 = arith.mulf %44, %43 : vector<128x128xf32>
    %46 = arith.addf %38, %45 : vector<128x128xf32>
    %cst_19 = arith.constant 2.000000e-01 : f32
    %47 = vector.broadcast %cst_19 : f32 to vector<128x128xf32>
    %48 = arith.mulf %47, %40 : vector<128x128xf32>
    %49 = arith.subf %40, %48 : vector<128x128xf32>
    %cst_20 = arith.constant 1.000000e+00 : f32
    %50 = vector.broadcast %cst_20 : f32 to vector<128x128xf32>
    %51 = arith.subf %46, %50 : vector<128x128xf32>
    %cst_21 = arith.constant 0.000000e+00 : f32
    %52 = vector.broadcast %cst_21 : f32 to vector<128x128xf32>
    %53 = arith.cmpf ogt, %51, %52 : vector<128x128xf32>
    %cst_22 = arith.constant 1.000000e+00 : f32
    %cst_23 = arith.constant 0.000000e+00 : f32
    %54 = vector.broadcast %cst_22 : f32 to vector<128x128xf32>
    %55 = vector.broadcast %cst_23 : f32 to vector<128x128xf32>
    %56 = arith.select %53, %54, %55 : vector<128x128xi1>, vector<128x128xf32>
    %cst_24 = arith.constant 1.000000e+00 : f32
    %57 = vector.broadcast %cst_24 : f32 to vector<128x128xf32>
    %58 = arith.subf %57, %56 : vector<128x128xf32>
    %59 = arith.mulf %58, %46 : vector<128x128xf32>
    %cst_25 = arith.constant 0.000000e+00 : f32
    %60 = vector.broadcast %cst_25 : f32 to vector<128x128xf32>
    %61 = arith.mulf %56, %60 : vector<128x128xf32>
    %62 = arith.addf %59, %61 : vector<128x128xf32>
    %63 = arith.addf %49, %36 : vector<128x128xf32>
    %c1_i32_26 = arith.constant 1 : i32
    %64 = tpu.dynamic_rotate %56 by %c1_i32_26 dim 0 : vector<128x128xf32>, i32 -> vector<128x128xf32>
    %cst_27 = arith.constant 0.000000e+00 : f32
    %65 = vector.broadcast %cst_27 : f32 to vector<128x128xf32>
    %66 = arith.select %19, %64, %65 : vector<128x128xi1>, vector<128x128xf32>
    %c127_i32_28 = arith.constant 127 : i32
    %67 = tpu.dynamic_rotate %56 by %c127_i32_28 dim 0 : vector<128x128xf32>, i32 -> vector<128x128xf32>
    %cst_29 = arith.constant 0.000000e+00 : f32
    %68 = vector.broadcast %cst_29 : f32 to vector<128x128xf32>
    %69 = arith.select %21, %67, %68 : vector<128x128xi1>, vector<128x128xf32>
    %70 = tpu.concatenate %66, %56, %69 in 1 : vector<128x128xf32>, vector<128x128xf32>, vector<128x128xf32> -> vector<128x384xf32>
    %71 = arith.truncf %70 : vector<128x384xf32> to vector<128x384xbf16>
    %c0_30 = arith.constant 0 : index
    %c0_31 = arith.constant 0 : index
    %72 = vector.load %arg3[%c0_30, %c0_31] : memref<384x128xbf16, #tpu.memory_space<vmem>>, vector<384x128xbf16>
    %cst_32 = arith.constant dense<0.000000e+00> : vector<128x128xf32>
    %73 = tpu.matmul %71, %72, %cst_32 {dimension_numbers = #tpu.dot_dimension_numbers<[1], [0], [0], [1], [0, 0, 1, 1], [], []>} : vector<128x384xbf16>, vector<384x128xbf16>, vector<128x128xf32> -> vector<128x128xf32>
    %74 = vector.broadcast %24 : vector<1x128xf32> to vector<128x128xf32>
    %75 = arith.addf %73, %74 : vector<128x128xf32>
    %76 = arith.addf %75, %0 : vector<128x128xf32>
    %c2 = arith.constant 2 : index
    %c0_33 = arith.constant 0 : index
    %c0_34 = arith.constant 0 : index
    %77 = vector.load %arg5[%c2, %c0_33, %c0_34] : memref<4x128x128xf32, #tpu.memory_space<vmem>>, vector<1x128x128xf32>
    %78 = vector.shape_cast %77 : vector<1x128x128xf32> to vector<128x128xf32>
    %c3 = arith.constant 3 : index
    %c0_35 = arith.constant 0 : index
    %c0_36 = arith.constant 0 : index
    %79 = vector.load %arg5[%c3, %c0_35, %c0_36] : memref<4x128x128xf32, #tpu.memory_space<vmem>>, vector<1x128x128xf32>
    %80 = vector.shape_cast %79 : vector<1x128x128xf32> to vector<128x128xf32>
    %cst_37 = arith.constant 0.000000e+00 : f32
    %81 = vector.broadcast %cst_37 : f32 to vector<128x128xf32>
    %82 = arith.subf %81, %78 : vector<128x128xf32>
    %83 = arith.addf %82, %80 : vector<128x128xf32>
    %cst_38 = arith.constant 1.000000e-01 : f32
    %84 = vector.broadcast %cst_38 : f32 to vector<128x128xf32>
    %85 = arith.mulf %84, %83 : vector<128x128xf32>
    %86 = arith.addf %78, %85 : vector<128x128xf32>
    %cst_39 = arith.constant 2.000000e-01 : f32
    %87 = vector.broadcast %cst_39 : f32 to vector<128x128xf32>
    %88 = arith.mulf %87, %80 : vector<128x128xf32>
    %89 = arith.subf %80, %88 : vector<128x128xf32>
    %cst_40 = arith.constant 1.000000e+00 : f32
    %90 = vector.broadcast %cst_40 : f32 to vector<128x128xf32>
    %91 = arith.subf %86, %90 : vector<128x128xf32>
    %cst_41 = arith.constant 0.000000e+00 : f32
    %92 = vector.broadcast %cst_41 : f32 to vector<128x128xf32>
    %93 = arith.cmpf ogt, %91, %92 : vector<128x128xf32>
    %cst_42 = arith.constant 1.000000e+00 : f32
    %cst_43 = arith.constant 0.000000e+00 : f32
    %94 = vector.broadcast %cst_42 : f32 to vector<128x128xf32>
    %95 = vector.broadcast %cst_43 : f32 to vector<128x128xf32>
    %96 = arith.select %93, %94, %95 : vector<128x128xi1>, vector<128x128xf32>
    %cst_44 = arith.constant 1.000000e+00 : f32
    %97 = vector.broadcast %cst_44 : f32 to vector<128x128xf32>
    %98 = arith.subf %97, %96 : vector<128x128xf32>
    %99 = arith.mulf %98, %86 : vector<128x128xf32>
    %cst_45 = arith.constant 0.000000e+00 : f32
    %100 = vector.broadcast %cst_45 : f32 to vector<128x128xf32>
    %101 = arith.mulf %96, %100 : vector<128x128xf32>
    %102 = arith.addf %99, %101 : vector<128x128xf32>
    %103 = arith.addf %89, %76 : vector<128x128xf32>
    %c0_46 = arith.constant 0 : index
    %c0_47 = arith.constant 0 : index
    %104 = vector.load %arg6[%c0_46, %c0_47] : memref<128x128xf32, #tpu.memory_space<vmem>>, vector<128x128xf32>
    tpu.vector_store %arg6[%c0_46, %c0_47], %96 {strides = array<i32>} : memref<128x128xf32, #tpu.memory_space<vmem>>, vector<128x128xf32>,
    %c0_48 = arith.constant 0 : index
    %c0_49 = arith.constant 0 : index
    %c0_50 = arith.constant 0 : index
    %105 = vector.load %arg7[%c0_48, %c0_49, %c0_50] : memref<4x128x128xf32, #tpu.memory_space<vmem>>, vector<1x128x128xf32>
    %106 = vector.shape_cast %105 : vector<1x128x128xf32> to vector<128x128xf32>
    %107 = vector.shape_cast %62 : vector<128x128xf32> to vector<1x128x128xf32>
    tpu.vector_store %arg7[%c0_48, %c0_49, %c0_50], %107 {strides = array<i32>} : memref<4x128x128xf32, #tpu.memory_space<vmem>>, vector<1x128x128xf32>,
    %c1_51 = arith.constant 1 : index
    %c0_52 = arith.constant 0 : index
    %c0_53 = arith.constant 0 : index
    %108 = vector.load %arg7[%c1_51, %c0_52, %c0_53] : memref<4x128x128xf32, #tpu.memory_space<vmem>>, vector<1x128x128xf32>
    %109 = vector.shape_cast %108 : vector<1x128x128xf32> to vector<128x128xf32>
    %110 = vector.shape_cast %63 : vector<128x128xf32> to vector<1x128x128xf32>
    tpu.vector_store %arg7[%c1_51, %c0_52, %c0_53], %110 {strides = array<i32>} : memref<4x128x128xf32, #tpu.memory_space<vmem>>, vector<1x128x128xf32>,
    %c2_54 = arith.constant 2 : index
    %c0_55 = arith.constant 0 : index
    %c0_56 = arith.constant 0 : index
    %111 = vector.load %arg7[%c2_54, %c0_55, %c0_56] : memref<4x128x128xf32, #tpu.memory_space<vmem>>, vector<1x128x128xf32>
    %112 = vector.shape_cast %111 : vector<1x128x128xf32> to vector<128x128xf32>
    %113 = vector.shape_cast %102 : vector<128x128xf32> to vector<1x128x128xf32>
    tpu.vector_store %arg7[%c2_54, %c0_55, %c0_56], %113 {strides = array<i32>} : memref<4x128x128xf32, #tpu.memory_space<vmem>>, vector<1x128x128xf32>,
    %c3_57 = arith.constant 3 : index
    %c0_58 = arith.constant 0 : index
    %c0_59 = arith.constant 0 : index
    %114 = vector.load %arg7[%c3_57, %c0_58, %c0_59] : memref<4x128x128xf32, #tpu.memory_space<vmem>>, vector<1x128x128xf32>
    %115 = vector.shape_cast %114 : vector<1x128x128xf32> to vector<128x128xf32>
    %116 = vector.shape_cast %103 : vector<128x128xf32> to vector<1x128x128xf32>
    tpu.vector_store %arg7[%c3_57, %c0_58, %c0_59], %116 {strides = array<i32>} : memref<4x128x128xf32, #tpu.memory_space<vmem>>, vector<1x128x128xf32>,
    return
  }
  func.func @transform_0(%arg0: i32) -> (i32, i32) {
    %c0_i32 = arith.constant 0 : i32
    %c0_i32_0 = arith.constant 0 : i32
    return %arg0, %c0_i32 : i32, i32
  }
  func.func @transform_1(%arg0: i32) -> (i32, i32) {
    %c0_i32 = arith.constant 0 : i32
    %c0_i32_0 = arith.constant 0 : i32
    %c0_i32_1 = arith.constant 0 : i32
    return %c0_i32, %c0_i32_0 : i32, i32
  }
  func.func @transform_2(%arg0: i32) -> (i32, i32) {
    %c0_i32 = arith.constant 0 : i32
    %c0_i32_0 = arith.constant 0 : i32
    %c0_i32_1 = arith.constant 0 : i32
    return %c0_i32, %c0_i32_0 : i32, i32
  }
  func.func @transform_3(%arg0: i32) -> (i32, i32) {
    %c0_i32 = arith.constant 0 : i32
    %c0_i32_0 = arith.constant 0 : i32
    %c0_i32_1 = arith.constant 0 : i32
    return %c0_i32, %c0_i32_0 : i32, i32
  }
  func.func @transform_4(%arg0: i32) -> (i32, i32, i32) {
    %c0_i32 = arith.constant 0 : i32
    %c0_i32_0 = arith.constant 0 : i32
    %c0_i32_1 = arith.constant 0 : i32
    return %c0_i32, %arg0, %c0_i32_0 : i32, i32, i32
  }
  func.func @transform_5(%arg0: i32) -> (i32, i32) {
    %c0_i32 = arith.constant 0 : i32
    %c0_i32_0 = arith.constant 0 : i32
    return %arg0, %c0_i32 : i32, i32
  }
  func.func @transform_6(%arg0: i32) -> (i32, i32, i32) {
    %c0_i32 = arith.constant 0 : i32
    %c0_i32_0 = arith.constant 0 : i32
    %c0_i32_1 = arith.constant 0 : i32
    return %c0_i32, %arg0, %c0_i32_0 : i32, i32, i32
  }
}

</mosaic_0001>

<bundles_post_ra>
// kernel: basic_block_step_ld.1
= control target key start
LH: loop header
LB: loop body
LE: loop exit
PB: predicated region body
PF: predicated region fallthrough
CT: control target
= control target key end

     0   :  { %12 = vsyncpa [#allocation3], 0  ;;  %s3717_s0 = inlined_call_operand.hbm [shape: f32[128,128], index: 0, kind: input, shape index: {}, may-alias: {0,5}]   ;;  %s3718_s1 = inlined_call_operand.hbm [shape: bf16[384,128], index: 1, kind: input, shape index: {}]   ;;  %s3719_s2 = inlined_call_operand.hbm [shape: bf16[384,128], index: 2, kind: input, shape index: {}]   ;;  %s3720_s3 = inlined_call_operand.vmem [shape: f32[2,128], index: 3, kind: input, shape index: {}]   ;;  %s3721_s4 = inlined_call_operand.hbm [shape: f32[4,128,128], index: 4, kind: input, shape index: {}, may-alias: {4,6}]   ;;  %s3722_s5 = inlined_call_operand.hbm [shape: f32[128,128], index: 5, kind: output, shape index: {0}, may-alias: {0,5}]   ;;  %s3723_s6 = inlined_call_operand.hbm [shape: f32[4,128,128], index: 6, kind: output, shape index: {1}, may-alias: {4,6}]  }
   0x1   :  { %13 = vsyncpa [#allocation6], 0 }
   0x2   :  { %14 = vsyncpa [#allocation9], 0 }
   0x3   :  { %15 = vsyncpa [#allocation4], 0 }
   0x4   :  { %16 = vsyncpa [#allocation12], 0  ;;  %s2657_s21 = smov [#allocation5]   ;;  %s2515_s25 = scalar_lea.hbm %s3718_s1, 3072 }
   0x5   :  { %s34_s22 = sshll.u32 %s2657_s21, 4  ;;  %p2516_p0 = scmp.ne.s32.totalorder %s3718_s1, %s2515_s25  ;;  %s35_s22 = int_to_ptr.vmem [resolvable:$true] %s34_s22 }
   0x6   :  { %p2519_p1 = scmp.lt.u32.totalorder %s2515_s25, %s3718_s1 }
   0x8   :  { %p2521_p2 = pnand %p2519_p1, %p2516_p0 }
   0xa   :  { %2524 = shalt.err (!%p2521_p2)
}
   0xb   :  { %s2525_s30 = scalar_lea.vmem %s35_s22, 3072  ;;  %p2530_p4 = scmp.lt.s32.totalorder %s35_s22, %s35_s22 }
   0xc   :  { %p2526_p3 = scmp.ne.s32.totalorder %s35_s22, %s2525_s30  ;;  %p2531_p5 = scmp.lt.s32.totalorder %s2525_s30, %s2525_s30 }
   0xe   :  { %p2532_p6 = por %p2531_p5, %p2530_p4 }
  0x10   :  { %p2533_p7 = pnand %p2532_p6, %p2526_p3 }
  0x12   :  { %2536 = shalt.err (!%p2533_p7)
}
  0x13   :  { %s2658_s7 = smov 64   ;;  %s2659_s8 = smov 4  }
  0x14   :  { %40 = dma.hbm_to_vmem [thread:$0]  %s3718_s1, 3072, %s35_s22, [#allocation6], %s2658_s7, %s2658_s7, %s2659_s8  }
  0x15   :  { %s2660_s11 = smov [#allocation2]   ;;  %s2537_s15 = scalar_lea.hbm %s3717_s0, 2048 }
  0x16   :  { %s22_s12 = sshll.u32 %s2660_s11, 4  ;;  %p2538_p8 = scmp.ne.s32.totalorder %s3717_s0, %s2537_s15  ;;  %s23_s12 = int_to_ptr.vmem [resolvable:$true] %s22_s12 }
  0x17   :  { %p2541_p9 = scmp.lt.u32.totalorder %s2537_s15, %s3717_s0 }
  0x19   :  { %p2543_p10 = pnand %p2541_p9, %p2538_p8 }
  0x1b   :  { %2546 = shalt.err (!%p2543_p10)
}
  0x1c   :  { %s2547_s20 = scalar_lea.vmem %s23_s12, 2048  ;;  %p2552_p12 = scmp.lt.s32.totalorder %s23_s12, %s23_s12 }
  0x1d   :  { %p2548_p11 = scmp.ne.s32.totalorder %s23_s12, %s2547_s20  ;;  %p2553_p13 = scmp.lt.s32.totalorder %s2547_s20, %s2547_s20 }
  0x1f   :  { %p2554_p0 = por %p2553_p13, %p2552_p12 }
  0x21   :  { %p2555_p1 = pnand %p2554_p0, %p2548_p11 }
  0x23   :  { %2558 = shalt.err (!%p2555_p1)
}
  0x24   :  { %s2661_s1 = smov 128   ;;  %s2662_s21 = smov 8  }
  0x25   :  { %28 = dma.hbm_to_vmem [thread:$0]  %s3717_s0, 2048, %s23_s12, [#allocation3], %s2661_s1, %s2661_s1, %s2662_s21  }
  0x26   :  { %s2663_s24 = smov [#allocation7]   ;;  %s2664_s26 = smov [#allocation8]  }
  0x27   :  { %s46_s25 = sshll.u32 %s2663_s24, 4  ;;  %s60_s27 = sshll.u32 %s2664_s26, 4  ;;  %s47_s25 = int_to_ptr.vmem [resolvable:$true] %s46_s25  ;;  %s2735_s27 = int_to_ptr.vmem [resolvable:$true] %s60_s27 }
  0x28   :  { %s2559_s30 = scalar_lea.hbm %s3719_s2, 3072 }
  0x29   :  { %p2560_p2 = scmp.ne.s32.totalorder %s3719_s2, %s2559_s30  ;;  %p2563_p3 = scmp.lt.u32.totalorder %s2559_s30, %s3719_s2 }
  0x2b   :  { %p2565_p4 = pnand %p2563_p3, %p2560_p2 }
  0x2d   :  { %2568 = shalt.err (!%p2565_p4)
}
  0x2e   :  { %s2569_s0 = scalar_lea.vmem %s47_s25, 3072  ;;  %p2574_p6 = scmp.lt.s32.totalorder %s47_s25, %s47_s25 }
  0x2f   :  { %p2570_p5 = scmp.ne.s32.totalorder %s47_s25, %s2569_s0  ;;  %p2575_p7 = scmp.lt.s32.totalorder %s2569_s0, %s2569_s0 }
  0x31   :  { %p2576_p8 = por %p2575_p7, %p2574_p6 }
  0x33   :  { %p2577_p9 = pnand %p2576_p8, %p2570_p5 }
  0x35   :  { %2580 = shalt.err (!%p2577_p9)
}
  0x36   :  { %52 = dma.hbm_to_vmem [thread:$0]  %s3719_s2, 3072, %s47_s25, [#allocation6], %s2658_s7, %s2658_s7, %s2659_s8  }
  0x37   :  { %s2581_s17 = scalar_lea.hbm %s3721_s4, 8192 }
  0x38   :  { %p2582_p10 = scmp.ne.s32.totalorder %s3721_s4, %s2581_s17  ;;  %p2585_p11 = scmp.lt.u32.totalorder %s2581_s17, %s3721_s4 }
  0x3a   :  { %p2587_p12 = pnand %p2585_p11, %p2582_p10 }
  0x3c   :  { %2590 = shalt.err (!%p2587_p12)
}
  0x3d   :  { %s2591_s23 = scalar_lea.vmem %s2735_s27, 8192  ;;  %p2596_p0 = scmp.lt.s32.totalorder %s2735_s27, %s2735_s27 }
  0x3e   :  { %p2592_p13 = scmp.ne.s32.totalorder %s2735_s27, %s2591_s23  ;;  %p2597_p1 = scmp.lt.s32.totalorder %s2591_s23, %s2591_s23 }
  0x40   :  { %p2598_p2 = por %p2597_p1, %p2596_p0 }
  0x42   :  { %p2599_p3 = pnand %p2598_p2, %p2592_p13 }
  0x44   :  { %2602 = shalt.err (!%p2599_p3)
}
  0x45   :  { %66 = dma.hbm_to_vmem [thread:$0]  %s3721_s4, 8192, %s2735_s27, [#allocation9], %s2661_s1, %s2661_s1, %s2662_s21  }
  0x46   :  { %2647 = dma.done.wait [#allocation3], 2048  }
  0x47   :  { %2648 = vsyncadd [#allocation3], 4294965248 }
  0x48   :  { %2649 = dma.done.wait [#allocation6], 6144  }
  0x49   :  { %2650 = vsyncadd [#allocation6], 4294961152 }
  0x4a   :  { %2651 = dma.done.wait [#allocation9], 8192  }
  0x4b   :  { %2652 = vsyncadd [#allocation9], 4294959104  ;;  %v2438_v0 = vld [vmem:[#allocation5 + $0x40] sm:$0xff]   ;;  %v2441_v3 = vld [vmem:[#allocation5 + $0x48] sm:$0xff]   ;;  %v96_v4 = vlaneseq  ;;  %vm2665_vm8 = vmmov 1   ;;  %v3760_v44 = vmov 0 }
  0x4c   :  { %v2439_v1 = vld [vmem:[#allocation5 + $0x80] sm:$0xff]   ;;  %2201 = vmatprep.subr.bf16.mxu0 %v2438_v0  ;;  %v2442_v5 = vld [vmem:[#allocation5 + $0x88] sm:$0xff]   ;;  %v2444_v7 = vld [vmem:[#allocation5 + $0x50] sm:$0xff]   ;;  %s2668_s4 = smov [#allocation10]  }
  0x4d   :  { %v2440_v2 = vld [vmem:[#allocation5] sm:$0xff]   ;;  %2361 = vmatprep.subr.bf16.mxu1 %v2439_v1  ;;  %v2443_v6 = vld [vmem:[#allocation5 + $0x8] sm:$0xff]   ;;  %v2445_v8 = vld [vmem:[#allocation5 + $0x90] sm:$0xff]   ;;  %v2772_v9 = vshrl.u32 %v96_v4, 7  ;;  %s1979_s8 = sshll.u32 %s2668_s4, 4  ;;  %s3569_s8 = int_to_ptr.vmem [resolvable:$true] %s1979_s8 }
  0x4e   :  { %2202 = vmatpush3.bf16.msra.mxu0 %v2440_v2  ;;  %2362 = vmatpush3.bf16.msra.mxu1 %v2439_v1  ;;  %v2446_v10 = vld [vmem:[#allocation5 + $0x10] sm:$0xff]   ;;  %v2447_v11 = vld [vmem:[#allocation5 + $0x58] sm:$0xff]   ;;  %v2450_v15 = vld [vmem:[#allocation5 + $0x60] sm:$0xff]   ;;  %p2608_p5 = scmp.lt.s32.totalorder %s3569_s8, %s3569_s8 }
  0x4f   :  { %2203 = vmatprep.subr.bf16.mxu0 %v2441_v3  ;;  %2363 = vmatprep.subr.bf16.mxu1 %v2442_v5  ;;  %v2448_v12 = vld [vmem:[#allocation5 + $0x98] sm:$0xff]   ;;  %v98_v14 = vadd.s32 8, %v2772_v9  ;;  %v117_v16 = vand.u32 15, %v2772_v9  ;;  %v2451_v17 = vld [vmem:[#allocation5 + $0xa0] sm:$0xff]   ;;  %v100_v18 = vadd.s32 24, %v2772_v9  ;;  %v102_v19 = vadd.s32 40, %v2772_v9 }
  0x50   :  { %v2449_v13 = vld [vmem:[#allocation5 + $0x18] sm:$0xff]   ;;  %v99_v20 = vadd.s32 16, %v2772_v9  ;;  %v2452_v21 = vld [vmem:[#allocation5 + $0x20] sm:$0xff]   ;;  %v104_v22 = vadd.s32 56, %v2772_v9  ;;  %v2453_v23 = vld [vmem:[#allocation5 + $0x68] sm:$0xff]   ;;  %vm3725_vm0 = vcmp.lt.s32.totalorder %v2772_v9, 1 }
  0x51   :  { %v124_v24 = vand.u32 15, %v98_v14  ;;  %v2454_v25 = vld [vmem:[#allocation5 + $0xa8] sm:$0xff]   ;;  %vm3724_vm1 = vcmp.lt.s32.totalorder %v2772_v9, 7  ;;  %vm2782_vm2 = vcmp.ge.s32.totalorder %v117_v16, 1  ;;  %v2787_v27 = vadd.s32 72, %v2772_v9  ;;  %v2456_v32 = vld [vmem:[#allocation5 + $0x70] sm:$0xff]  }
  0x52   :  { %2204 = vmatpush3.bf16.msra.mxu0 %v2443_v6  ;;  %2364 = vmatpush3.bf16.msra.mxu1 %v2442_v5  ;;  %v138_v28 = vand.u32 15, %v100_v18  ;;  %v2790_v29 = vadd.s32 32, %v2772_v9  ;;  %v2455_v30 = vld [vmem:[#allocation5 + $0x28] sm:$0xff]   ;;  %v152_v31 = vand.u32 15, %v102_v19  ;;  %v131_v33 = vand.u32 15, %v99_v20  ;;  %v2457_v34 = vld [vmem:[#allocation5 + $0xb0] sm:$0xff]   ;;  %vm2860_vm10 = vmpackc.low %vm2665_vm8, %vm2782_vm2 }
  0x53   :  { %2205 = vmatprep.subr.bf16.mxu0 %v2444_v7  ;;  %2365 = vmatprep.subr.bf16.mxu1 %v2445_v8  ;;  %v166_v35 = vand.u32 15, %v104_v22  ;;  %v2458_v36 = vld [vmem:[#allocation5 + $0x30] sm:$0xff]   ;;  %vm2792_vm3 = vcmp.lt.s32.totalorder %v124_v24, 15  ;;  %v2459_v38 = vld [vmem:[#allocation5 + $0x78] sm:$0xff]   ;;  %v2800_v40 = vld [vmem:[#allocation2] sm:$0xff]  ;;  %v180_v45 = vand.u32 15, %v2787_v27 }
  0x54   :  { %vm2796_vm4 = vcmp.lt.s32.totalorder %v138_v28, 15  ;;  %v2802_v41 = vld [vmem:[#allocation2 + $0x8] sm:$0xff]  ;;  %v2804_v42 = vld [vmem:[#allocation2 + $0x10] sm:$0xff]  ;;  %vm2806_vm5 = vcmp.lt.s32.totalorder %v152_v31, 15  ;;  %vm2810_vm6 = vcmp.ge.s32.totalorder %v131_v33, 1  ;;  %v2460_v46 = vld [vmem:[#allocation5 + $0xb8] sm:$0xff]  }
  0x55   :  { %v338_v47 = vrot.slane %v2800_v40, 7  ;;  %v339_v48 = vrot.slane %v2802_v41, 7  ;;  %v437_v49 = vpack.c.bf16 %v2802_v41, %v2800_v40  ;;  %v387_v50 = vrot.slane %v2800_v40, 1  ;;  %v2820_v51 = vld [vmem:[#allocation2 + $0x78] sm:$0xff]  ;;  %v2831_v58 = vld [vmem:[#allocation2 + $0x20] sm:$0xff]  ;;  %vm2837_vm9 = vmpackc.low %vm2792_vm3, %vm2665_vm8 }
  0x56   :  { %2206 = vmatpush3.bf16.msra.mxu0 %v2446_v10  ;;  %2366 = vmatpush3.bf16.msra.mxu1 %v2445_v8  ;;  %v2822_v52 = vld [vmem:[#allocation2 + $0x18] sm:$0xff]  ;;  %vm2824_vm7 = vcmp.lt.s32.totalorder %v166_v35, 15  ;;  %v388_v55 = vrot.slane %v2802_v41, 1  ;;  %v389_v56 = vrot.slane %v2804_v42, 1  ;;  %v353_v57 = vrot.slane %v2820_v51, 7  ;;  %v2462_v7 = vld [vmem:[#allocation7 + $0x40] sm:$0xff]   ;;  %vm2876_vm11 = vmpackc.low %vm2796_vm4, %vm2665_vm8 }
  0x57   :  { %2207 = vmatprep.subr.bf16.mxu0 %v2447_v11  ;;  %2367 = vmatprep.subr.bf16.mxu1 %v2448_v12  ;;  %v2461_v54 = vld [vmem:[#allocation5 + $0x38] sm:$0xff]   ;;  %v390_v59 = vrot.slane %v2822_v52, 1  ;;  %v369_v61 = vsel %vm3725_vm0, %v338_v47, %v339_v48  ;;  %v391_v62 = vrot.slane %v2831_v58, 1  ;;  %v108_v63 = vadd.s32 88, %v2772_v9  ;;  %v2465_v11 = vld [vmem:[#allocation7 + $0x80] sm:$0xff]   ;;  %v2885_v19 = vld [vmem:[#allocation2 + $0x28] sm:$0xff] }
  0x58   :  { %688 = vmatprep.mubr.bf16.mxu0 %v437_v49  ;;  %v417_v0 = vsel %vm3724_vm1, %v388_v55, %v389_v56  ;;  %v418_v1 = vsel %vm3724_vm1, %v387_v50, %v388_v55  ;;  %v370_v2 = vsel %vm3725_vm0, %v353_v57, %v338_v47  ;;  %v110_v4 = vadd.s32 104, %v2772_v9  ;;  %v2463_v18 = vld [vmem:[#allocation7] sm:$0xff]   ;;  %v2887_v20 = vld [vmem:[#allocation2 + $0x30] sm:$0xff]  ;;  %v2464_v24 = vld [vmem:[#allocation7 + $0x48] sm:$0xff]  }
  0x59   :  { %v2058_v5 = vpack.c.bf16 %v417_v0, %v418_v1  ;;  %v415_v6 = vsel %vm3724_vm1, %v390_v59, %v391_v62  ;;  %v340_v8 = vrot.slane %v2804_v42, 7  ;;  %v416_v10 = vsel %vm3724_vm1, %v389_v56, %v390_v59  ;;  %v2894_v28 = vld [vmem:[#allocation2 + $0x38] sm:$0xff]  ;;  %vm2904_vm13 = vmpackc.low %vm2806_vm5, %vm2665_vm8  ;;  %v2467_v47 = vld [vmem:[#allocation7 + $0x50] sm:$0xff]  }
  0x5a   :  { %2208 = vmatpush3.bf16.msra.mxu0 %v2449_v13  ;;  %2368 = vmatpush3.bf16.msra.mxu1 %v2448_v12  ;;  %v341_v12 = vrot.slane %v2822_v52, 7  ;;  %v2034_v13 = vpack.c.bf16 %v369_v61, %v370_v2  ;;  %vm2880_vm12 = vcmp.lt.s32.totalorder %v180_v45, 15  ;;  %v194_v22 = vand.u32 15, %v108_v63  ;;  %vm2929_vm14 = vmpackc.low %vm2665_vm8, %vm2810_vm6  ;;  %v2470_v49 = vld [vmem:[#allocation7 + $0x88] sm:$0xff]   ;;  %v2468_v59 = vld [vmem:[#allocation7 + $0x10] sm:$0xff]  }
  0x5b   :  { %2209 = vmatprep.subr.bf16.mxu0 %v2450_v15  ;;  %2369 = vmatprep.subr.bf16.mxu1 %v2451_v17  ;;  %v2061_v15 = vpack.c.bf16 %v415_v6, %v416_v10  ;;  %v392_v26 = vrot.slane %v2885_v19, 1  ;;  %v393_v27 = vrot.slane %v2887_v20, 1  ;;  %v2899_v31 = vadd.s32 120, %v2772_v9  ;;  %vm2940_vm15 = vmpackc.low %vm2824_vm7, %vm2665_vm8  ;;  %v2959_v61 = vld [vmem:[#allocation2 + $0x48] sm:$0xff]  ;;  %v2469_v2 = vld [vmem:[#allocation7 + $0x58] sm:$0xff]  }
  0x5c   :  { %2377 = vmatprep.mubr.msk.bf16.mxu1 %vm2837_vm9, %v2058_v5  ;;  %v367_v33 = vsel %vm3725_vm0, %v340_v8, %v341_v12  ;;  %v3761_v44 = vsel %vm2940_vm15, 4294967295, %v3760_v44  ;;  %vm2948_vm3 = vcmp.lt.s32.totalorder %v194_v22, 15  ;;  %v342_v63 = vrot.slane %v2831_v58, 7  ;;  %v2978_v10 = vld [vmem:[#allocation2 + $0x60] sm:$0xff]  ;;  %vm2989_vm6 = vmpackc.low %vm2880_vm12, %vm2665_vm8 }
  0x5d   :  { %v414_v37 = vsel %vm3724_vm1, %v391_v62, %v392_v26  ;;  %v2961_v62 = vld [vmem:[#allocation2 + $0x50] sm:$0xff]  ;;  %v2969_v1 = vadd.s32 64, %v2772_v9  ;;  %v396_v5 = vrot.slane %v2959_v61, 1  ;;  %v3098_v40 = vadd.s32 112, %v2772_v9 }
  0x5e   :  { %2210 = vmatpush3.bf16.msra.mxu0 %v2452_v21  ;;  %2370 = vmatpush3.bf16.msra.mxu1 %v2451_v17  ;;  %v103_v17 = vadd.s32 48, %v2772_v9  ;;  %v145_v21 = vand.u32 15, %v2790_v29  ;;  %v2466_v29 = vld [vmem:[#allocation7 + $0x8] sm:$0xff]   ;;  %v397_v6 = vrot.slane %v2961_v62, 1  ;;  %v366_v16 = vsel %vm3725_vm0, %v341_v12, %v342_v63 }
  0x5f   :  { %2211 = vmatprep.subr.bf16.mxu0 %v2453_v23  ;;  %2371 = vmatprep.subr.bf16.mxu1 %v2454_v25  ;;  %v208_v23 = vand.u32 15, %v110_v4  ;;  %v443_v4 = vpack.c.bf16 %v2885_v19, %v2831_v58 }
  0x60   :  { %vm2944_vm2 = vcmp.ge.s32.totalorder %v145_v21, 1  ;;  %v2471_v21 = vld [vmem:[#allocation7 + $0x18] sm:$0xff]  }
  0x61   :  { %vm2954_vm4 = vcmp.lt.s32.totalorder %v208_v23, 15  ;;  %v344_v23 = vrot.slane %v2887_v20, 7  ;;  %vm3024_vm12 = vmpackc.low %vm2665_vm8, %vm2944_vm2  ;;  %vm3778_vm2 = vcmp.lt.s32.totalorder %v2772_v9, 7 }
  0x62   :  { %2212 = vmatpush3.bf16.msra.mxu0 %v2455_v30  ;;  %2372 = vmatpush3.bf16.msra.mxu1 %v2454_v25  ;;  %v440_v25 = vpack.c.bf16 %v2822_v52, %v2804_v42  ;;  %v2896_v30 = vld [vmem:[#allocation2 + $0x40] sm:$0xff]  ;;  %v159_v42 = vand.u32 15, %v103_v17  ;;  %v3770_v17 = vmov 0  ;;  %v2475_v52 = vld [vmem:[#allocation7 + $0x90] sm:$0xff]  }
  0x63   :  { %2213 = vmatprep.subr.bf16.mxu0 %v2456_v32  ;;  %2373 = vmatprep.subr.bf16.mxu1 %v2457_v34  ;;  %v395_v35 = vrot.slane %v2896_v30, 1  ;;  %v3771_v17 = vsel %vm2989_vm6, 4294967295, %v3770_v17 }
  0x64   :  { %vm2964_vm5 = vcmp.ge.s32.totalorder %v159_v42, 1  ;;  %v3776_v42 = vmov 0 }
  0x65   :  { %v410_v58 = vsel %vm3724_vm1, %v395_v35, %v396_v5 }
  0x66   :  { %2214 = vmatpush3.bf16.msra.mxu0 %v2458_v36  ;;  %2374 = vmatpush3.bf16.msra.mxu1 %v2457_v34  ;;  %v394_v34 = vrot.slane %v2894_v28, 1  ;;  %v413_v36 = vsel %vm3724_vm1, %v392_v26, %v393_v27 }
  0x67   :  { %2215 = vmatprep.subr.bf16.mxu0 %v2459_v38  ;;  %2375 = vmatprep.subr.bf16.mxu1 %v2460_v46  ;;  %v368_v38 = vsel %vm3725_vm0, %v339_v48, %v340_v8  ;;  %v2064_v43 = vpack.c.bf16 %v413_v36, %v414_v37  ;;  %v2976_v8 = vld [vmem:[#allocation2 + $0x58] sm:$0xff]  ;;  %v173_v36 = vand.u32 15, %v2969_v1  ;;  %v2476_v1 = vld [vmem:[#allocation7 + $0x28] sm:$0xff]  }
  0x68   :  { %v411_v45 = vsel %vm3724_vm1, %v394_v34, %v395_v35  ;;  %v412_v41 = vsel %vm3724_vm1, %v393_v27, %v394_v34  ;;  %v2037_v55 = vpack.c.bf16 %v367_v33, %v368_v38  ;;  %v2472_v27 = vld [vmem:[#allocation7 + $0x60] sm:$0xff]   ;;  %v446_v33 = vpack.c.bf16 %v2894_v28, %v2887_v20  ;;  %v3030_v34 = vld [vmem:[#allocation2 + $0x68] sm:$0xff] }
  0x69   :  { %v2067_v56 = vpack.c.bf16 %v411_v45, %v412_v41  ;;  %v402_v35 = vrot.slane %v2820_v51, 1  ;;  %v3042_v45 = vld [vmem:[#allocation2 + $0x70] sm:$0xff]  ;;  %v400_v20 = vrot.slane %v3030_v34, 1  ;;  %v2473_v41 = vld [vmem:[#allocation7 + $0x20] sm:$0xff]  }
  0x6a   :  { %2216 = vmatpush3.bf16.msra.mxu0 %v2461_v54  ;;  %2376 = vmatpush3.bf16.msra.mxu1 %v2460_v46  ;;  %v222_v54 = vand.u32 15, %v2899_v31  ;;  %v345_v31 = vrot.slane %v2894_v28, 7  ;;  %v346_v28 = vrot.slane %v2896_v30, 7  ;;  %v2474_v46 = vld [vmem:[#allocation7 + $0x68] sm:$0xff]  }
  0x6b   :  { %2281 = vmatprep.subr.bf16.mxu1 %v2462_v7  ;;  %2393 = vmatprep.subr.bf16.mxu0 %v2465_v11  ;;  %v343_v7 = vrot.slane %v2885_v19, 7  ;;  %v2997_v19 = vadd.s32 96, %v2772_v9 }
  0x6c   :  { %vm3017_vm7 = vcmp.lt.s32.totalorder %v222_v54, 15  ;;  %v3049_v48 = vsel %vm3725_vm0, %v344_v23, %v345_v31  ;;  %v347_v54 = vrot.slane %v2959_v61, 7 }
  0x6d   :  { %2035 = vmatmul.mubr.msk.bf16.vlgmr.msra.gmra.mrb[0].mxu0 %vm2860_vm10, %v2034_v13  ;;  %2378 = vmatmul.mubr.msk.bf16.vlgmr.msra.gmra.mrb[0].mxu1 %vm2876_vm11, %v2061_v15  ;;  %v399_v13 = vrot.slane %v2978_v10, 1  ;;  %v409_v15 = vsel %vm3724_vm1, %v396_v5, %v397_v6  ;;  %v350_v5 = vrot.slane %v2978_v10, 7 }
  0x6e   :  { %2282 = vmatpush3.bf16.msra.mxu1 %v2463_v18  ;;  %2394 = vmatpush3.bf16.msra.mxu0 %v2465_v11  ;;  %v398_v11 = vrot.slane %v2976_v8, 1  ;;  %v2994_v18 = vadd.s32 80, %v2772_v9  ;;  %v2070_v22 = vpack.c.bf16 %v409_v15, %v410_v58  ;;  %v2480_v58 = vld [vmem:[#allocation7 + $0x98] sm:$0xff]  }
  0x6f   :  { %2283 = vmatprep.subr.bf16.mxu1 %v2464_v24  ;;  %696 = vmatprep.mubr.bf16.mxu0 %v440_v25  ;;  %v365_v24 = vsel %vm3725_vm0, %v342_v63, %v343_v7  ;;  %v349_v63 = vrot.slane %v2976_v8, 7 }
  0x70   :  { %2381 = vmatprep.mubr.msk.bf16.mxu1 %vm2904_vm13, %v2064_v43  ;;  %2395 = vmatprep.subr.bf16.mxu0 %v2470_v49  ;;  %v407_v25 = vsel %vm3724_vm1, %v398_v11, %v399_v13  ;;  %v408_v26 = vsel %vm3724_vm1, %v397_v6, %v398_v11  ;;  %v187_v37 = vand.u32 15, %v2994_v18  ;;  %v2040_v38 = vpack.c.bf16 %v365_v24, %v366_v16  ;;  %vm3038_vm1 = vmpackc.low %vm2948_vm3, %vm2665_vm8  ;;  %v2477_v11 = vld [vmem:[#allocation7 + $0x70] sm:$0xff]   ;;  %v850_v16 = vld [vmem:[#allocation8] sm:$0xff] }
  0x71   :  { %v3777_v42 = vsel %vm3038_vm1, 4294967295, %v3776_v42  ;;  %v2073_v43 = vpack.c.bf16 %v407_v25, %v408_v26  ;;  %vm3061_vm3 = vmpackc.low %vm2954_vm4, %vm2665_vm8  ;;  %v2478_v26 = vld [vmem:[#allocation7 + $0x30] sm:$0xff]   ;;  %v883_v12 = vsub.f32 0.0, %v850_v16 }
  0x72   :  { %2284 = vmatpush3.bf16.msra.mxu1 %v2466_v29  ;;  %2396 = vmatpush3.bf16.msra.mxu0 %v2470_v49  ;;  %v3053_v49 = vsel %vm3725_vm0, %v343_v7, %v344_v23  ;;  %vm3781_vm0 = vmmov %vm3778_vm2  ;;  %v878_v29 = vld [vmem:[#allocation8 + $0xd8] sm:$0xff] }
  0x73   :  { %2285 = vmatprep.subr.bf16.mxu1 %v2467_v47  ;;  %2397 = vmatprep.subr.bf16.mxu0 %v2475_v52  ;;  %v401_v47 = vrot.slane %v3042_v45, 1  ;;  %v2043_v7 = vpack.c.bf16 %v3049_v48, %v3053_v49  ;;  %v419_v0 = vsel %vm3781_vm0, %v402_v35, %v387_v50  ;;  %vm3784_vm4 = vmmov %vm3781_vm0  ;;  %v3786_v50 = vmov 0 }
  0x75   :  { %2038 = vmatmul.mubr.msk.bf16.gmra.mrb[4].mxu0 %vm2929_vm14, %v2037_v55  ;;  %2382 = vmatmul.mubr.msk.bf16.gmra.mrb[4].mxu1 %vm2940_vm15, %v2067_v56  ;;  %v406_v55 = vsel %vm3778_vm2, %v399_v13, %v400_v20  ;;  %v3779_v56 = vmov 0  ;;  %v351_v13 = vrot.slane %v3030_v34, 7  ;;  %v404_v15 = vsel %vm3784_vm4, %v401_v47, %v402_v35  ;;  %vm3105_vm2 = vmpackc.low %vm3017_vm7, %vm2665_vm8 }
  0x76   :  { %2286 = vmatpush3.bf16.msra.mxu1 %v2468_v59  ;;  %704 = vmatprep.mubr.bf16.mxu0 %v443_v4  ;;  %v3780_v56 = vsel %vm3061_vm3, 4294967295, %v3779_v56  ;;  %v348_v59 = vrot.slane %v2961_v62, 7  ;;  %v3787_v50 = vsel %vm3105_vm2, 4294967295, %v3786_v50  ;;  %v452_v35 = vpack.c.bf16 %v2976_v8, %v2961_v62 }
  0x77   :  { %2287 = vmatprep.subr.bf16.mxu1 %v2469_v2  ;;  %2385 = vmatprep.mubr.msk.bf16.mxu1 %vm2989_vm6, %v2070_v22  ;;  %v405_v2 = vsel %vm3781_vm0, %v400_v20, %v401_v47  ;;  %vm3072_vm6 = vmpackc.low %vm2665_vm8, %vm2964_vm5  ;;  %vm3785_vm5 = vcmp.lt.s32.totalorder %v2772_v9, 1  ;;  %vm3109_vm0 = vcmp.ge.s32.totalorder %v173_v36, 1  ;;  %v882_v20 = vld [vmem:[#allocation8 + $0xf8] sm:$0xff] }
  0x78   :  { %2398 = vmatpush3.bf16.msra.mxu0 %v2475_v52  ;;  %v2076_v6 = vpack.c.bf16 %v405_v2, %v406_v55  ;;  %v3095_v22 = vsel %vm3785_vm5, %v345_v31, %v346_v28  ;;  %vm3790_vm4 = vmmov %vm3785_vm5  ;;  %v867_v31 = vld [vmem:[#allocation8 + $0x80] sm:$0xff]  ;;  %v868_v52 = vld [vmem:[#allocation8 + $0x88] sm:$0xff] }
  0x79   :  { %v3115_v23 = vsel %vm3790_vm4, %v346_v28, %v347_v54  ;;  %vm3791_vm5 = vmmov %vm3790_vm4  ;;  %2399 = vmatprep.subr.bf16.mxu0 %v2480_v58  ;;  %v899_v47 = vadd.f32 %v883_v12, %v867_v31  ;;  %v852_v55 = vld [vmem:[#allocation8 + $0x10] sm:$0xff]  ;;  %v853_v2 = vld [vmem:[#allocation8 + $0x18] sm:$0xff] }
  0x7a   :  { %2288 = vmatpush3.bf16.msra.mxu1 %v2471_v21  ;;  %v449_v21 = vpack.c.bf16 %v2959_v61, %v2896_v30  ;;  %v851_v30 = vld [vmem:[#allocation8 + $0x8] sm:$0xff]  ;;  %v3119_v24 = vsel %vm3791_vm5, %v348_v59, %v349_v63  ;;  %v2046_v49 = vpack.c.bf16 %v3115_v23, %v3095_v22  ;;  %v886_v12 = vsub.f32 0.0, %v853_v2 }
  0x7b   :  { %2289 = vmatprep.subr.bf16.mxu1 %v2472_v27  ;;  %v865_v27 = vld [vmem:[#allocation8 + $0x78] sm:$0xff]  ;;  %v915_v31 = vmul.f32 0.1, %v899_v47  ;;  %v3800_v23 = vand.u32 15, %v2997_v19 }
  0x7c   :  { %2400 = vmatpush3.bf16.msra.mxu0 %v2480_v58  ;;  %v898_v28 = vsub.f32 0.0, %v865_v27  ;;  %v2481_v58 = vld [vmem:[#allocation7 + $0x38] sm:$0xff]  }
  0x7d   :  { %2041 = vmatmul.mubr.msk.bf16.gmra.mrb[8].mxu0 %vm3024_vm12, %v2040_v38  ;;  %2386 = vmatmul.mubr.msk.bf16.gmra.mrb[8].mxu1 %vm3038_vm1, %v2073_v43  ;;  %v2079_v38 = vpack.c.bf16 %v419_v0, %v404_v15  ;;  %v2479_v43 = vld [vmem:[#allocation7 + $0x78] sm:$0xff]  }
  0x7e   :  { %2290 = vmatpush3.bf16.msra.mxu1 %v2473_v41  ;;  %712 = vmatprep.mubr.bf16.mxu0 %v446_v33  ;;  %v884_v33 = vsub.f32 0.0, %v851_v30  ;;  %v870_v0 = vld [vmem:[#allocation8 + $0x98] sm:$0xff] }
  0x7f   :  { %2291 = vmatprep.subr.bf16.mxu1 %v2474_v46  ;;  %2389 = vmatprep.mubr.msk.bf16.mxu1 %vm3061_vm3, %v2076_v6  ;;  %vm3792_vm3 = vmmov %vm3790_vm4  ;;  %v352_v46 = vrot.slane %v3042_v45, 7  ;;  %v869_v6 = vld [vmem:[#allocation8 + $0x90] sm:$0xff] }
  0x80   :  { %v3123_v25 = vsel %vm3792_vm3, %v347_v54, %v348_v59  ;;  %vm3793_vm7 = vmmov %vm3792_vm3  ;;  %v3133_v41 = vsel %vm3792_vm3, %v350_v5, %v351_v13  ;;  %v900_v48 = vadd.f32 %v884_v33, %v868_v52  ;;  %v2482_v54 = vld [vmem:[#allocation7 + $0xa0] sm:$0xff]   ;;  %v2483_v33 = vld [vmem:[#allocation7 + $0xa8] sm:$0xff]  }
  0x81   :  { %v3129_v36 = vsel %vm3793_vm7, %v349_v63, %v350_v5  ;;  %v914_v63 = vadd.f32 %v898_v28, %v882_v20  ;;  %v885_v5 = vsub.f32 0.0, %v852_v55  ;;  %2401 = vmatprep.subr.bf16.mxu0 %v2482_v54  ;;  %vm3794_vm4 = vmmov %vm3792_vm3  ;;  %vm3162_vm7 = vcmp.ge.s32.totalorder %v187_v37, 1  ;;  %v2484_v37 = vld [vmem:[#allocation7 + $0xb0] sm:$0xff]  }
  0x82   :  { %2292 = vmatpush3.bf16.msra.mxu1 %v2476_v1  ;;  %v916_v52 = vmul.f32 0.1, %v900_v48  ;;  %v3154_v47 = vsel %vm3794_vm4, %v352_v46, %v353_v57  ;;  %vm3795_vm5 = vmmov %vm3792_vm3  ;;  %v931_v1 = vadd.f32 %v915_v31, %v850_v16  ;;  %v871_v57 = vld [vmem:[#allocation8 + $0xa0] sm:$0xff]  ;;  %2402 = vmatpush3.bf16.msra.mxu0 %v2482_v54  ;;  %v872_v16 = vld [vmem:[#allocation8 + $0xa8] sm:$0xff] }
  0x83   :  { %2293 = vmatprep.subr.bf16.mxu1 %v2477_v11  ;;  %v930_v20 = vmul.f32 0.1, %v914_v63  ;;  %v901_v28 = vadd.f32 %v885_v5, %v869_v6  ;;  %v3158_v48 = vsel %vm3795_vm5, %v351_v13, %v352_v46  ;;  %v3166_v63 = vld [vmem:[#allocation8 + $0x20] sm:$0xff]  ;;  %v3168_v6 = vld [vmem:[#allocation8 + $0x28] sm:$0xff]  ;;  %2403 = vmatprep.subr.bf16.mxu0 %v2483_v33  ;;  %v3179_v54 = vld [vmem:[#allocation8 + $0x30] sm:$0xff] }
  0x84   :  { %v932_v11 = vadd.f32 %v916_v52, %v851_v30  ;;  %v887_v30 = vsub.f32 0.0, %v3166_v63  ;;  %v888_v18 = vsub.f32 0.0, %v3168_v6  ;;  %vm3184_vm5 = vmpackc.low %vm2665_vm8, %vm3109_vm0  ;;  %vm3803_vm0 = vcmp.lt.s32.totalorder %v2772_v9, 1 }
  0x85   :  { %2044 = vmatmul.mubr.msk.bf16.gmra.mrb[12].mxu0 %vm3072_vm6, %v2043_v7  ;;  %2390 = vmatmul.mubr.msk.bf16.gmra.mrb[12].mxu1 %vm3105_vm2, %v2079_v38  ;;  %v902_v7 = vadd.f32 %v886_v12, %v870_v0  ;;  %v946_v13 = vadd.f32 %v930_v20, %v865_v27  ;;  %vm3240_vm15 = vmpackc.low %vm2665_vm8, %vm3162_vm7 }
  0x86   :  { %2294 = vmatpush3.bf16.msra.mxu1 %v2478_v26  ;;  %720 = vmatprep.mubr.bf16.mxu0 %v449_v21  ;;  %v917_v21 = vmul.f32 0.1, %v901_v28  ;;  %v2081_v26 = vadd.f32 -1.0, %v931_v1  ;;  %v2082_v46 = vadd.f32 -1.0, %v932_v11  ;;  %v903_v27 = vadd.f32 %v887_v30, %v871_v57 }
  0x87   :  { %2295 = vmatprep.subr.bf16.mxu1 %v2479_v43  ;;  %v918_v0 = vmul.f32 0.1, %v902_v7  ;;  %v3175_v52 = vadd.f32 -1.0, %v946_v13  ;;  %v904_v43 = vadd.f32 %v888_v18, %v872_v16  ;;  %v3732_v57 = vmov 0.0   ;;  %2404 = vmatpush3.bf16.msra.mxu0 %v2483_v33 }
  0x88   :  { %v3177_v12 = vadd.f32 %v917_v21, %v852_v55  ;;  %vm995_vm3 = vcmp.gt.f32.partialorder %v2081_v26, 0.0  ;;  %vm996_vm4 = vcmp.gt.f32.partialorder %v2082_v46, 0.0  ;;  %v2485_v55 = vld [vmem:[#allocation7 + $0xb8] sm:$0xff]   ;;  %v3730_v26 = vmov 1.0|1.0   ;;  %2405 = vmatprep.subr.bf16.mxu0 %v2484_v37 }
  0x89   :  { %v3188_v28 = vadd.f32 %v918_v0, %v853_v2  ;;  %vm3734_vm2 = vcmp.gt.f32.partialorder %v3175_v52, 0.0  ;;  %v3193_v21 = vsel %vm995_vm3, 1.0, %v3732_v57  ;;  %vm2121_vm1 = vmpackc.low %vm996_vm4, %vm995_vm3 }
  0x8a   :  { %2296 = vmatpush3.bf16.msra.mxu1 %v2481_v58  ;;  %v3196_v58 = vsel %vm996_vm4, 1.0, %v3732_v57  ;;  %v2083_v61 = vadd.f32 -1.0, %v3177_v12  ;;  %v3202_v2 = vsel %vm3734_vm2, 1.0, %v3732_v57  ;;  %v1027_v16 = vsub.f32 1.0, %v3193_v21  ;;  %2122 = vmatprep.mubr.msk.bf16.mxu1 %vm2121_vm1, %v3730_v26  ;;  %vm3804_vm3 = vmmov %vm3803_vm0 }
  0x8b   :  { %v1028_v30 = vsub.f32 1.0, %v3196_v58  ;;  %v1059_v18 = vmul.f32 0.0, %v3193_v21  ;;  %v1042_v46 = vsub.f32 1.0, %v3202_v2  ;;  %v1060_v0 = vmul.f32 0.0, %v3196_v58  ;;  %2406 = vmatpush3.bf16.msra.mxu0 %v2484_v37 }
  0x8c   :  { %v1074_v33 = vmul.f32 0.0, %v3202_v2  ;;  %v1107_v31 = vrot.slane %v3193_v21, 7  ;;  %v1043_v7 = vmul.f32 %v1027_v16, %v931_v1  ;;  %v1108_v15 = vrot.slane %v3196_v58, 7  ;;  %2407 = vmatprep.subr.bf16.mxu0 %v2485_v55 }
  0x8d   :  { %2047 = vmatmul.mubr.msk.bf16.gmra.mrb[16].mxu0 %vm3184_vm5, %v2046_v49  ;;  %v1044_v5 = vmul.f32 %v1028_v30, %v932_v11  ;;  %v1122_v59 = vrot.slane %v3202_v2, 7  ;;  %v1058_v26 = vmul.f32 %v1042_v46, %v946_v13  ;;  %v1155_v57 = vrot.slane %v3193_v21, 1 }
  0x8e   :  { %728 = vmatprep.mubr.bf16.mxu0 %v452_v35  ;;  %v1156_v53 = vrot.slane %v3196_v58, 1  ;;  %v2084_v22 = vadd.f32 -1.0, %v3188_v28  ;;  %vm3227_vm1 = vcmp.ge.s32.totalorder %v3800_v23, 1  ;;  %v1075_v1 = vadd.f32 %v1059_v18, %v1043_v7 }
  0x8f   :  { %v1076_v11 = vadd.f32 %v1060_v0, %v1044_v5  ;;  %v1137_v62 = vsel %vm3803_vm0, %v1107_v31, %v1108_v15  ;;  %v1138_v8 = vsel %vm3804_vm3, %v1122_v59, %v1107_v31  ;;  %v1090_v35 = vadd.f32 %v1074_v33, %v1058_v26  ;;  %v3252_v26 = vld [vmem:[#allocation8 + $0x38] sm:$0xff]  ;;  %2408 = vmatpush3.bf16.msra.mxu0 %v2485_v55 }
  0x90   :  { %v2124_v13 = vpack.c.bf16 %v1137_v62, %v1138_v8  ;;  %vm997_vm4 = vcmp.gt.f32.partialorder %v2083_v61, 0.0  ;;  %vm998_vm2 = vcmp.gt.f32.partialorder %v2084_v22, 0.0  ;;  %1907 = vst [vmem:[#allocation11] sm:$0xff] %v1075_v1  ;;  %v3807_v5 = vmov 0.0   ;;  %v874_v62 = vld [vmem:[#allocation8 + $0xb8] sm:$0xff]  ;;  %v3266_v8 = vld [vmem:[#allocation8 + $0x40] sm:$0xff] }
  0x91   :  { %1908 = vst [vmem:[#allocation11 + $0x8] sm:$0xff] %v1076_v11  ;;  %v1013_v37 = vsel %vm997_vm4, 1.0, %v3807_v5  ;;  %v3246_v7 = vsel %vm998_vm2, 1.0, %v3807_v5  ;;  %vm2126_vm0 = vmpackc.low %vm998_vm2, %vm997_vm4  ;;  %v919_v31 = vmul.f32 0.1, %v903_v27  ;;  %v3809_v23 = vpack.c.bf16 %v3119_v24, %v3123_v25  ;;  %v873_v11 = vld [vmem:[#allocation8 + $0xb0] sm:$0xff] }
  0x92   :  { %v920_v16 = vmul.f32 0.1, %v904_v43  ;;  %1922 = vst [vmem:[#allocation11 + $0x78] sm:$0xff] %v1090_v35  ;;  %2125 = vmatmul.mubr.msk.bf16.vlgmr.msra.gmra.mrb[16].mxu1 %vm2860_vm10, %v2124_v13  ;;  %v1029_v38 = vsub.f32 1.0, %v1013_v37  ;;  %v1030_v61 = vsub.f32 1.0, %v3246_v7  ;;  %v1061_v30 = vmul.f32 0.0, %v1013_v37  ;;  %vm3811_vm2 = vmmov %vm3804_vm3 }
  0x93   :  { %v1062_v18 = vmul.f32 0.0, %v3246_v7  ;;  %v1109_v46 = vrot.slane %v1013_v37, 7  ;;  %v1110_v0 = vrot.slane %v3246_v7, 7  ;;  %v1157_v33 = vrot.slane %v1013_v37, 1  ;;  %vm3812_vm7 = vmmov %vm3811_vm2 }
  0x94   :  { %v1158_v27 = vrot.slane %v3246_v7, 1  ;;  %v3808_v43 = vmov 1.0|1.0   ;;  %v1045_v3 = vmul.f32 %v1029_v38, %v3177_v12  ;;  %v1046_v22 = vmul.f32 %v1030_v61, %v3188_v28 }
  0x95   :  { %2127 = vmatprep.mubr.msk.bf16.mxu1 %vm2126_vm0, %v3808_v43  ;;  %2050 = vmatmul.mubr.msk.bf16.gmra.mrb[20].mxu0 %vm3240_vm15, %v3809_v23  ;;  %v935_v55 = vadd.f32 %v919_v31, %v3166_v63  ;;  %v936_v1 = vadd.f32 %v920_v16, %v3168_v6  ;;  %vm3810_vm10 = vcmp.lt.s32.totalorder %v2772_v9, 7  ;;  %v1135_v12 = vsel %vm3811_vm2, %v1109_v46, %v1110_v0  ;;  %v3280_v6 = vld [vmem:[#allocation8 + $0x48] sm:$0xff] }
  0x96   :  { %v3270_v35 = vsel %vm3810_vm10, %v1157_v33, %v1158_v27  ;;  %v1136_v24 = vsel %vm3812_vm7, %v1108_v15, %v1109_v46  ;;  %v3813_v25 = vpack.c.bf16 %v3030_v34, %v2978_v10  ;;  %v890_v63 = vsub.f32 0.0, %v3252_v26  ;;  %vm3818_vm0 = vmmov %vm3810_vm10 }
  0x97   :  { %v1077_v28 = vadd.f32 %v1061_v30, %v1045_v3  ;;  %v1078_v13 = vadd.f32 %v1062_v18, %v1046_v22  ;;  %v2129_v37 = vpack.c.bf16 %v1135_v12, %v1136_v24  ;;  %v2085_v7 = vadd.f32 -1.0, %v935_v55  ;;  %vm3819_vm10 = vmmov %vm3818_vm0 }
  0x98   :  { %736 = vmatprep.mubr.bf16.mxu0 %v3813_v25  ;;  %v3814_v31 = vand.u32 15, %v3098_v40  ;;  %v2086_v38 = vadd.f32 -1.0, %v936_v1  ;;  %v3817_v15 = vsub.f32 0.0, %v3179_v54  ;;  %v906_v10 = vadd.f32 %v890_v63, %v874_v62  ;;  %vm3312_vm7 = vmpackc.low %vm2665_vm8, %vm3227_vm1 }
  0x99   :  { %v891_v34 = vsub.f32 0.0, %v3266_v8  ;;  %1909 = vst [vmem:[#allocation11 + $0x10] sm:$0xff] %v1077_v28  ;;  %1910 = vst [vmem:[#allocation11 + $0x18] sm:$0xff] %v1078_v13  ;;  %vm999_vm4 = vcmp.gt.f32.partialorder %v2085_v7, 0.0  ;;  %v892_v30 = vsub.f32 0.0, %v3280_v6  ;;  %v3296_v40 = vsel %vm3818_vm0, %v1156_v53, %v1157_v33  ;;  %v876_v7 = vld [vmem:[#allocation8 + $0xc8] sm:$0xff] }
  0x9a   :  { %vm3284_vm3 = vcmp.ge.s32.totalorder %v3814_v31, 1  ;;  %v905_v61 = vadd.f32 %v3817_v15, %v873_v11  ;;  %v3304_v18 = vsel %vm3819_vm10, %v1155_v57, %v1156_v53  ;;  %vm1000_vm2 = vcmp.gt.f32.partialorder %v2086_v38, 0.0  ;;  %2130 = vmatmul.mubr.msk.bf16.gmra.mrb[20].mxu1 %vm2929_vm14, %v2129_v37  ;;  %v875_v37 = vld [vmem:[#allocation8 + $0xc0] sm:$0xff]  ;;  %vm3824_vm1 = vmmov %vm3819_vm10  ;;  %v860_v38 = vld [vmem:[#allocation8 + $0x50] sm:$0xff] }
  0x9b   :  { %v3307_v46 = vsel %vm999_vm4, 1.0, %v3807_v5  ;;  %v922_v22 = vmul.f32 0.1, %v906_v10  ;;  %v3319_v58 = vsel %vm1000_vm2, 1.0, %v3807_v5  ;;  %vm2131_vm0 = vmpackc.low %vm1000_vm2, %vm999_vm4  ;;  %v3822_v63 = vpack.c.bf16 %v3133_v41, %v3129_v36 }
  0x9c   :  { %v921_v33 = vmul.f32 0.1, %v905_v61  ;;  %v1031_v53 = vsub.f32 1.0, %v3307_v46  ;;  %v1063_v23 = vmul.f32 0.0, %v3307_v46  ;;  %v1111_v11 = vrot.slane %v3307_v46, 7  ;;  %2132 = vmatprep.mubr.msk.bf16.mxu1 %vm2131_vm0, %v3808_v43  ;;  %vm3362_vm0 = vmpackc.low %vm2665_vm8, %vm3284_vm3 }
  0x9d   :  { %v1032_v49 = vsub.f32 1.0, %v3319_v58  ;;  %v1064_v62 = vmul.f32 0.0, %v3319_v58  ;;  %v1112_v12 = vrot.slane %v3319_v58, 7  ;;  %v1159_v24 = vrot.slane %v3307_v46, 1  ;;  %2053 = vmatmul.mubr.msk.bf16.gmra.mrb[24].mxu0 %vm3312_vm7, %v3822_v63  ;;  %vm3832_vm3 = vmmov %vm3824_vm1 }
  0x9e   :  { %v1047_v39 = vmul.f32 %v1031_v53, %v935_v55  ;;  %v1160_v25 = vrot.slane %v3319_v58, 1  ;;  %vm3823_vm14 = vcmp.lt.s32.totalorder %v2772_v9, 1  ;;  %v937_v13 = vadd.f32 %v921_v33, %v3179_v54  ;;  %v3350_v54 = vld [vmem:[#allocation8 + $0x58] sm:$0xff] }
  0x9f   :  { %v1134_v28 = vsel %vm3823_vm14, %v1110_v0, %v1111_v11  ;;  %v1048_v31 = vmul.f32 %v1032_v49, %v936_v1  ;;  %v3342_v55 = vsel %vm3824_vm1, %v1158_v27, %v1159_v24  ;;  %vm3825_vm4 = vmmov %vm3823_vm14  ;;  %v3826_v41 = vpack.c.bf16 %v2820_v51, %v3042_v45 }
  0xa0   :  { %v1133_v36 = vsel %vm3825_vm4, %v1111_v11, %v1112_v12  ;;  %v938_v0 = vadd.f32 %v922_v22, %v3252_v26  ;;  %v1079_v15 = vadd.f32 %v1063_v23, %v1047_v39  ;;  %v2165_v1 = vpack.c.bf16 %v3342_v55, %v3270_v35  ;;  %v877_v39 = vld [vmem:[#allocation8 + $0xd0] sm:$0xff]  ;;  %vm3830_vm8 = vmmov %vm3825_vm4 }
  0xa1   :  { %744 = vmatprep.mubr.bf16.mxu0 %v3826_v41  ;;  %v2134_v61 = vpack.c.bf16 %v1133_v36, %v1134_v28  ;;  %v2087_v10 = vadd.f32 -1.0, %v937_v13  ;;  %v1080_v27 = vadd.f32 %v1064_v62, %v1048_v31  ;;  %v907_v53 = vadd.f32 %v891_v34, %v875_v37 }
  0xa2   :  { %v2088_v33 = vadd.f32 -1.0, %v938_v0  ;;  %v908_v49 = vadd.f32 %v892_v30, %v876_v7  ;;  %1911 = vst [vmem:[#allocation11 + $0x20] sm:$0xff] %v1079_v15  ;;  %v2162_v51 = vpack.c.bf16 %v3296_v40, %v3304_v18  ;;  %v893_v45 = vsub.f32 0.0, %v860_v38 }
  0xa3   :  { %vm1001_vm10 = vcmp.gt.f32.partialorder %v2087_v10, 0.0  ;;  %v894_v26 = vsub.f32 0.0, %v3350_v54  ;;  %1912 = vst [vmem:[#allocation11 + $0x28] sm:$0xff] %v1080_v27  ;;  %v923_v34 = vmul.f32 0.1, %v907_v53  ;;  %2135 = vmatmul.mubr.msk.bf16.gmra.mrb[24].mxu1 %vm3024_vm12, %v2134_v61  ;;  %v3829_v36 = vpack.c.bf16 %v3154_v47, %v3158_v48  ;;  %vm3831_vm12 = vmmov %vm3825_vm4 }
  0xa4   :  { %vm1002_vm2 = vcmp.gt.f32.partialorder %v2088_v33, 0.0  ;;  %v1017_v22 = vsel %vm1001_vm10, 1.0, %v3807_v5  ;;  %v924_v30 = vmul.f32 0.1, %v908_v49  ;;  %vm3834_vm4 = vmmov %vm3832_vm3 }
  0xa5   :  { %v3369_v40 = vsel %vm1002_vm2, 1.0, %v3807_v5  ;;  %v1033_v18 = vsub.f32 1.0, %v1017_v22  ;;  %v1065_v11 = vmul.f32 0.0, %v1017_v22  ;;  %v1113_v62 = vrot.slane %v1017_v22, 7  ;;  %vm2136_vm14 = vmpackc.low %vm1002_vm2, %vm1001_vm10  ;;  %2056 = vmatmul.mubr.msk.bf16.gmra.mrb[28].mxu0 %vm3362_vm0, %v3829_v36 }
  0xa6   :  { %v1034_v16 = vsub.f32 1.0, %v3369_v40  ;;  %v1066_v63 = vmul.f32 0.0, %v3369_v40  ;;  %v1114_v28 = vrot.slane %v3369_v40, 7  ;;  %v1161_v37 = vrot.slane %v1017_v22, 1  ;;  %2137 = vmatprep.mubr.msk.bf16.mxu1 %vm2136_vm14, %v3808_v43  ;;  %2409 = vmatprep.mubr.msk.bf16.mxu0 %vm2837_vm9, %v2162_v51  ;;  %vm3833_vm9 = vmmov %vm3832_vm3 }
  0xa7   :  { %v1049_v7 = vmul.f32 %v1033_v18, %v937_v13  ;;  %v1162_v31 = vrot.slane %v3369_v40, 1  ;;  %v1132_v41 = vsel %vm3830_vm8, %v1112_v12, %v1113_v62  ;;  %v939_v15 = vadd.f32 %v923_v34, %v3266_v8  ;;  %vm3835_vm14 = vmmov %vm3830_vm8 }
  0xa8   :  { %v1050_v61 = vmul.f32 %v1034_v16, %v938_v0  ;;  %v1131_v10 = vsel %vm3831_vm12, %v1113_v62, %v1114_v28  ;;  %v940_v27 = vadd.f32 %v924_v30, %v3280_v6  ;;  %v909_v13 = vadd.f32 %v893_v45, %v877_v39  ;;  %v862_v39 = vld [vmem:[#allocation8 + $0x60] sm:$0xff]  ;;  %v863_v16 = vld [vmem:[#allocation8 + $0x68] sm:$0xff] }
  0xa9   :  { %v1081_v33 = vadd.f32 %v1065_v11, %v1049_v7  ;;  %v2139_v47 = vpack.c.bf16 %v1131_v10, %v1132_v41  ;;  %v2089_v48 = vadd.f32 -1.0, %v939_v15  ;;  %v910_v53 = vadd.f32 %v894_v26, %v878_v29  ;;  %v864_v7 = vld [vmem:[#allocation8 + $0x70] sm:$0xff] }
  0xaa   :  { %v1082_v49 = vadd.f32 %v1066_v63, %v1050_v61  ;;  %v2090_v22 = vadd.f32 -1.0, %v940_v27  ;;  %v925_v40 = vmul.f32 0.1, %v909_v13  ;;  %v1180_v8 = vsel %vm3832_vm3, %v1160_v25, %v1161_v37  ;;  %v3425_v61 = vld [vmem:[#allocation8 + $0xe0] sm:$0xff] }
  0xab   :  { %1913 = vst [vmem:[#allocation11 + $0x30] sm:$0xff] %v1081_v33  ;;  %vm1003_vm1 = vcmp.gt.f32.partialorder %v2089_v48, 0.0  ;;  %v926_v12 = vmul.f32 0.1, %v910_v53  ;;  %v1181_v60 = vsel %vm3833_vm9, %v1159_v24, %v1160_v25  ;;  %v3402_v6 = vsel %vm3834_vm4, %v1161_v37, %v1162_v31  ;;  %2140 = vmatmul.mubr.msk.bf16.gmra.mrb[28].mxu1 %vm3072_vm6, %v2139_v47  ;;  %vm3836_vm6 = vmmov %vm3830_vm8  ;;  %v3432_v47 = vld [vmem:[#allocation8 + $0xe8] sm:$0xff] }
  0xac   :  { %1914 = vst [vmem:[#allocation11 + $0x38] sm:$0xff] %v1082_v49  ;;  %vm1004_vm10 = vcmp.gt.f32.partialorder %v2090_v22, 0.0  ;;  %v1019_v0 = vsel %vm1003_vm1, 1.0, %v3807_v5  ;;  %v941_v51 = vadd.f32 %v925_v40, %v860_v38  ;;  %v2168_v45 = vpack.c.bf16 %v1180_v8, %v1181_v60  ;;  %vm3837_vm8 = vmmov %vm3832_vm3  ;;  %v3443_v60 = vld [vmem:[#allocation8 + $0xf0] sm:$0xff] }
  0xad   :  { %v1020_v58 = vsel %vm1004_vm10, 1.0, %v3807_v5  ;;  %v1035_v26 = vsub.f32 1.0, %v1019_v0  ;;  %v1067_v46 = vmul.f32 0.0, %v1019_v0  ;;  %v1115_v34 = vrot.slane %v1019_v0, 7  ;;  %vm2141_vm2 = vmpackc.low %vm1004_vm10, %vm1003_vm1  ;;  %2410 = vmatmul.mubr.msk.bf16.vlgmr.msra.gmra.mrb[32].mxu0 %vm2876_vm11, %v2165_v1 }
  0xae   :  { %v1036_v24 = vsub.f32 1.0, %v1020_v58  ;;  %v1068_v25 = vmul.f32 0.0, %v1020_v58  ;;  %v1116_v30 = vrot.slane %v1020_v58, 7  ;;  %v1163_v18 = vrot.slane %v1019_v0, 1  ;;  %2142 = vmatprep.mubr.msk.bf16.mxu1 %vm2141_vm2, %v3808_v43  ;;  %2413 = vmatprep.mubr.msk.bf16.mxu0 %vm2904_vm13, %v2168_v45  ;;  %vm3838_vm13 = vmmov %vm3832_vm3 }
  0xaf   :  { %v1051_v11 = vmul.f32 %v1035_v26, %v939_v15  ;;  %v1164_v62 = vrot.slane %v1020_v58, 1  ;;  %v1130_v38 = vsel %vm3835_vm14, %v1114_v28, %v1115_v34  ;;  %v942_v4 = vadd.f32 %v926_v12, %v3350_v54  ;;  %vm3839_vm1 = vmmov %vm3836_vm6 }
  0xb0   :  { %v1052_v63 = vmul.f32 %v1036_v24, %v940_v27  ;;  %v1129_v37 = vsel %vm3836_vm6, %v1115_v34, %v1116_v30  ;;  %v2091_v29 = vadd.f32 -1.0, %v941_v51  ;;  %v1178_v28 = vsel %vm3837_vm8, %v1162_v31, %v1163_v18  ;;  %vm3843_vm14 = vmmov %vm3834_vm4 }
  0xb1   :  { %v1083_v35 = vadd.f32 %v1067_v46, %v1051_v11  ;;  %v2144_v55 = vpack.c.bf16 %v1129_v37, %v1130_v38  ;;  %v2092_v14 = vadd.f32 -1.0, %v942_v4  ;;  %v2171_v1 = vpack.c.bf16 %v1178_v28, %v3402_v6 }
  0xb2   :  { %v1084_v54 = vadd.f32 %v1068_v25, %v1052_v63  ;;  %vm1005_vm11 = vcmp.gt.f32.partialorder %v2091_v29, 0.0  ;;  %v895_v36 = vsub.f32 0.0, %v862_v39  ;;  %v896_v41 = vsub.f32 0.0, %v863_v16 }
  0xb3   :  { %1915 = vst [vmem:[#allocation11 + $0x40] sm:$0xff] %v1083_v35  ;;  %vm1006_vm12 = vcmp.gt.f32.partialorder %v2092_v14, 0.0  ;;  %v1021_v15 = vsel %vm1005_vm11, 1.0, %v3807_v5  ;;  %v1177_v32 = vsel %vm3838_vm13, %v1163_v18, %v1164_v62  ;;  %v897_v31 = vsub.f32 0.0, %v864_v7  ;;  %2145 = vmatmul.mubr.msk.bf16.gmra.mrb[32].mxu1 %vm3184_vm5, %v2144_v55  ;;  %vm3840_vm5 = vmmov %vm3839_vm1 }
  0xb4   :  { %1916 = vst [vmem:[#allocation11 + $0x48] sm:$0xff] %v1084_v54  ;;  %v3430_v10 = vsel %vm1006_vm12, 1.0, %v3807_v5  ;;  %v1037_v27 = vsub.f32 1.0, %v1021_v15  ;;  %v1069_v13 = vmul.f32 0.0, %v1021_v15  ;;  %v1117_v33 = vrot.slane %v1021_v15, 7  ;;  %vm2146_vm3 = vmpackc.low %vm1006_vm12, %vm1005_vm11 }
  0xb5   :  { %v1038_v48 = vsub.f32 1.0, %v3430_v10  ;;  %v1070_v53 = vmul.f32 0.0, %v3430_v10  ;;  %v1118_v49 = vrot.slane %v3430_v10, 7  ;;  %v1165_v22 = vrot.slane %v1021_v15, 1  ;;  %2147 = vmatprep.mubr.msk.bf16.mxu1 %vm2146_vm3, %v3808_v43  ;;  %vm3845_vm12 = vmmov %vm3839_vm1 }
  0xb6   :  { %v1053_v40 = vmul.f32 %v1037_v27, %v941_v51  ;;  %v1128_v8 = vsel %vm3839_vm1, %v1116_v30, %v1117_v33  ;;  %v911_v12 = vadd.f32 %v895_v36, %v3425_v61  ;;  %vm3841_vm9 = vnez %v3761_v44  ;;  %vm3846_vm13 = vmmov %vm3834_vm4 }
  0xb7   :  { %v1054_v6 = vmul.f32 %v1038_v48, %v942_v4  ;;  %v1127_v20 = vsel %vm3840_vm5, %v1117_v33, %v1118_v49  ;;  %2414 = vmatmul.mubr.msk.bf16.gmra.mrb[36].mxu0 %vm3841_vm9, %v2171_v1  ;;  %v912_v0 = vadd.f32 %v896_v41, %v3432_v47  ;;  %v1176_v51 = vsel %vm3834_vm4, %v1164_v62, %v1165_v22  ;;  %vm3849_vm9 = vmmov %vm3834_vm4 }
  0xb8   :  { %v1085_v45 = vadd.f32 %v1069_v13, %v1053_v40  ;;  %v927_v58 = vmul.f32 0.1, %v911_v12  ;;  %v2174_v26 = vpack.c.bf16 %v1176_v51, %v1177_v32  ;;  %v2149_v34 = vpack.c.bf16 %v1127_v20, %v1128_v8  ;;  %v1634_v51 = vld [vmem:[#allocation8 + $0x100] sm:$0xff] }
  0xb9   :  { %v1086_v46 = vadd.f32 %v1070_v53, %v1054_v6  ;;  %v928_v24 = vmul.f32 0.1, %v912_v0  ;;  %v913_v25 = vadd.f32 %v897_v31, %v3443_v60  ;;  %v1166_v30 = vrot.slane %v3430_v10, 1  ;;  %v3500_v0 = vld [vmem:[#allocation8 + $0x190] sm:$0xff] }
  0xba   :  { %1917 = vst [vmem:[#allocation11 + $0x50] sm:$0xff] %v1085_v45  ;;  %v943_v18 = vadd.f32 %v927_v58, %v862_v39  ;;  %vm3842_vm10 = vnez %v3771_v17  ;;  %v1170_v17 = vrot.slane %v3202_v2, 1  ;;  %vm3847_vm3 = vcmp.gt.f32.partialorder %v3175_v52, 0.0  ;;  %v1637_v45 = vld [vmem:[#allocation8 + $0x118] sm:$0xff] }
  0xbb   :  { %2417 = vmatprep.mubr.msk.bf16.mxu0 %vm3842_vm10, %v2174_v26  ;;  %1918 = vst [vmem:[#allocation11 + $0x58] sm:$0xff] %v1086_v46  ;;  %v944_v44 = vadd.f32 %v928_v24, %v863_v16  ;;  %v929_v11 = vmul.f32 0.1, %v913_v25  ;;  %2150 = vmatmul.mubr.msk.bf16.gmra.mrb[36].mxu1 %vm3240_vm15, %v2149_v34  ;;  %v1175_v63 = vsel %vm3843_vm14, %v1165_v22, %v1166_v30  ;;  %vm3844_vm15 = vmmov %vm3839_vm1  ;;  %vm3848_vm5 = vnez %v3777_v42  ;;  %v3503_v46 = vld [vmem:[#allocation8 + $0x180] sm:$0xff]  ;;  %v1635_v34 = vld [vmem:[#allocation8 + $0x108] sm:$0xff] }
  0xbc   :  { %v2093_v38 = vadd.f32 -1.0, %v943_v18  ;;  %v1186_v52 = vsel %vm3834_vm4, %v1170_v17, %v1155_v57  ;;  %vm3850_vm10 = vmmov %vm3834_vm4  ;;  %v1667_v26 = vsub.f32 0.0, %v1634_v51  ;;  %v3506_v25 = vld [vmem:[#allocation8 + $0x198] sm:$0xff] }
  0xbd   :  { %v2094_v62 = vadd.f32 -1.0, %v944_v44  ;;  %v945_v4 = vadd.f32 %v929_v11, %v864_v7  ;;  %vm3853_vm14 = vmmov %vm3834_vm4 }
  0xbe   :  { %vm1007_vm2 = vcmp.gt.f32.partialorder %v2093_v38, 0.0  ;;  %v1683_v23 = vadd.f32 %v1667_v26, %v3503_v46 }
  0xbf   :  { %vm1008_vm6 = vcmp.gt.f32.partialorder %v2094_v62, 0.0  ;;  %v1023_v37 = vsel %vm1007_vm2, 1.0, %v3807_v5  ;;  %v2095_v39 = vadd.f32 -1.0, %v945_v4 }
  0xc0   :  { %v1024_v29 = vsel %vm1008_vm6, 1.0, %v3807_v5  ;;  %v1039_v16 = vsub.f32 1.0, %v1023_v37  ;;  %v1071_v28 = vmul.f32 0.0, %v1023_v37  ;;  %v1119_v35 = vrot.slane %v1023_v37, 7  ;;  %vm2151_vm8 = vmpackc.low %vm1008_vm6, %vm1007_vm2 }
  0xc1   :  { %v1040_v19 = vsub.f32 1.0, %v1024_v29  ;;  %v1072_v55 = vmul.f32 0.0, %v1024_v29  ;;  %v1120_v14 = vrot.slane %v1024_v29, 7  ;;  %v1167_v7 = vrot.slane %v1023_v37, 1  ;;  %2152 = vmatprep.mubr.msk.bf16.mxu1 %vm2151_vm8, %v3808_v43 }
  0xc2   :  { %v1055_v1 = vmul.f32 %v1039_v16, %v943_v18  ;;  %v1168_v54 = vrot.slane %v1024_v29, 1  ;;  %v1126_v36 = vsel %vm3844_vm15, %v1118_v49, %v1119_v35  ;;  %vm1009_vm11 = vcmp.gt.f32.partialorder %v2095_v39, 0.0  ;;  %v3509_v18 = vld [vmem:[#allocation8 + $0x188] sm:$0xff]  ;;  %v3512_v16 = vld [vmem:[#allocation8 + $0x1b0] sm:$0xff] }
  0xc3   :  { %v1056_v41 = vmul.f32 %v1040_v19, %v944_v44  ;;  %v1125_v15 = vsel %vm3845_vm12, %v1119_v35, %v1120_v14  ;;  %v1174_v32 = vsel %vm3846_vm13, %v1166_v30, %v1167_v7  ;;  %v1025_v31 = vsel %vm1009_vm11, 1.0, %v3807_v5  ;;  %vm2156_vm1 = vmpackc.low %vm3847_vm3, %vm1009_vm11 }
  0xc4   :  { %v1087_v10 = vadd.f32 %v1071_v28, %v1055_v1  ;;  %v2154_v27 = vpack.c.bf16 %v1125_v15, %v1126_v36  ;;  %v2177_v13 = vpack.c.bf16 %v1174_v32, %v1175_v63  ;;  %v1041_v33 = vsub.f32 1.0, %v1025_v31  ;;  %v1638_v28 = vld [vmem:[#allocation8 + $0x120] sm:$0xff] }
  0xc5   :  { %v1088_v48 = vadd.f32 %v1072_v55, %v1056_v41  ;;  %v1073_v53 = vmul.f32 0.0, %v1025_v31  ;;  %v1121_v49 = vrot.slane %v1025_v31, 7  ;;  %v1169_v22 = vrot.slane %v1025_v31, 1  ;;  %v3516_v15 = vld [vmem:[#allocation8 + $0x1a0] sm:$0xff] }
  0xc6   :  { %1919 = vst [vmem:[#allocation11 + $0x60] sm:$0xff] %v1087_v10  ;;  %2155 = vmatmul.mubr.msk.bf16.gmra.mrb[40].mxu1 %vm3312_vm7, %v2154_v27  ;;  %2418 = vmatmul.mubr.msk.bf16.gmra.mrb[40].mxu0 %vm3848_vm5, %v2177_v13  ;;  %v1057_v40 = vmul.f32 %v1041_v33, %v945_v4  ;;  %v1173_v8 = vsel %vm3849_vm9, %v1167_v7, %v1168_v54  ;;  %vm3851_vm7 = vmmov %vm3845_vm12  ;;  %vm3854_vm6 = vnez %v3780_v56  ;;  %v1670_v56 = vsub.f32 0.0, %v1637_v45  ;;  %v1640_v4 = vld [vmem:[#allocation8 + $0x130] sm:$0xff] }
  0xc7   :  { %1920 = vst [vmem:[#allocation11 + $0x68] sm:$0xff] %v1088_v48  ;;  %2157 = vmatprep.mubr.msk.bf16.mxu1 %vm2156_vm1, %v3808_v43  ;;  %v1172_v12 = vsel %vm3850_vm10, %v1168_v54, %v1169_v22  ;;  %v1123_v42 = vsel %vm3851_vm7, %v1121_v49, %v1122_v59  ;;  %vm3852_vm2 = vmmov %vm3851_vm7  ;;  %v1171_v21 = vsel %vm3853_vm14, %v1169_v22, %v1170_v17  ;;  %v1636_v59 = vld [vmem:[#allocation8 + $0x110] sm:$0xff]  ;;  %v1699_v11 = vmul.f32 0.1, %v1683_v23 }
  0xc8   :  { %v1124_v3 = vsel %vm3852_vm2, %v1120_v14, %v1121_v49  ;;  %v1089_v6 = vadd.f32 %v1073_v53, %v1057_v40  ;;  %v2180_v20 = vpack.c.bf16 %v1172_v12, %v1173_v8  ;;  %v2183_v43 = vpack.c.bf16 %v1186_v52, %v1171_v21  ;;  %v1641_v40 = vld [vmem:[#allocation8 + $0x138] sm:$0xff] }
  0xc9   :  { %v2159_v57 = vpack.c.bf16 %v1123_v42, %v1124_v3  ;;  %vm3855_vm8 = vnez %v3787_v50  ;;  %v1669_v2 = vsub.f32 0.0, %v1636_v59  ;;  %v1668_v50 = vsub.f32 0.0, %v1635_v34 }
  0xca   :  { %1921 = vst [vmem:[#allocation11 + $0x70] sm:$0xff] %v1089_v6  ;;  %2421 = vmatprep.mubr.msk.bf16.mxu0 %vm3854_vm6, %v2180_v20  ;;  %v1686_v30 = vadd.f32 %v1670_v56, %v3506_v25  ;;  %v1715_v37 = vadd.f32 %v1699_v11, %v1634_v51  ;;  %v1673_v17 = vsub.f32 0.0, %v1640_v4  ;;  %v1671_v1 = vsub.f32 0.0, %v1638_v28 }
  0xcb   :  { %v1685_v58 = vadd.f32 %v1669_v2, %v3500_v0  ;;  %v1684_v38 = vadd.f32 %v1668_v50, %v3509_v18 }
  0xcc   :  { %v1702_v62 = vmul.f32 0.1, %v1686_v30  ;;  %v2185_v35 = vadd.f32 -1.0, %v1715_v37  ;;  %v1689_v55 = vadd.f32 %v1673_v17, %v3512_v16  ;;  %v1687_v10 = vadd.f32 %v1671_v1, %v3516_v15 }
  0xcd   :  { %v1701_v24 = vmul.f32 0.1, %v1685_v58  ;;  %v1700_v39 = vmul.f32 0.1, %v1684_v38  ;;  %v1639_v58 = vld [vmem:[#allocation8 + $0x128] sm:$0xff] }
  0xce   :  { %2160 = vmatmul.mubr.msk.bf16.gmra.mrb[44].mxu1 %vm3362_vm0, %v2159_v57  ;;  %2422 = vmatmul.mubr.msk.bf16.gmra.mrb[44].mxu0 %vm3855_vm8, %v2183_v43  ;;  %v1718_v29 = vadd.f32 %v1702_v62, %v1637_v45  ;;  %vm1779_vm15 = vcmp.gt.f32.partialorder %v2185_v35, 0.0  ;;  %v1705_v31 = vmul.f32 0.1, %v1689_v55  ;;  %v1703_v42 = vmul.f32 0.1, %v1687_v10  ;;  %v3522_v45 = vld [vmem:[#allocation8 + $0x1b8] sm:$0xff] }
  0xcf   :  { %v1717_v44 = vadd.f32 %v1701_v24, %v1636_v59  ;;  %v1716_v19 = vadd.f32 %v1700_v39, %v1635_v34  ;;  %v1795_v32 = vsel %vm1779_vm15, 1.0, %v3807_v5  ;;  %v1674_v59 = vsub.f32 0.0, %v1641_v40  ;;  %v1644_v24 = vld [vmem:[#allocation8 + $0x150] sm:$0xff]  ;;  %v1643_v55 = vld [vmem:[#allocation8 + $0x148] sm:$0xff] }
  0xd0   :  { %v2188_v7 = vadd.f32 -1.0, %v1718_v29  ;;  %v1811_v13 = vsub.f32 1.0, %v1795_v32  ;;  %v1843_v33 = vmul.f32 0.0, %v1795_v32  ;;  %1891 = vst [vmem:[#allocation10] sm:$0xff] %v1795_v32  ;;  %v1721_v22 = vadd.f32 %v1705_v31, %v1640_v4  ;;  %v3527_v4 = vld [vmem:[#allocation8 + $0x1a8] sm:$0xff]  ;;  %v3530_v35 = vld [vmem:[#allocation8 + $0x1d0] sm:$0xff] }
  0xd1   :  { %v2187_v63 = vadd.f32 -1.0, %v1717_v44  ;;  %v2186_v41 = vadd.f32 -1.0, %v1716_v19  ;;  %v1719_v43 = vadd.f32 %v1703_v42, %v1638_v28  ;;  %v1690_v34 = vadd.f32 %v1674_v59, %v3522_v45  ;;  %v3533_v31 = vld [vmem:[#allocation8 + $0x1c0] sm:$0xff] }
  0xd2   :  { %vm1782_vm11 = vcmp.gt.f32.partialorder %v2188_v7, 0.0  ;;  %v1827_v52 = vmul.f32 %v1811_v13, %v1715_v37  ;;  %v2191_v20 = vadd.f32 -1.0, %v1721_v22  ;;  %v1672_v11 = vsub.f32 0.0, %v1639_v58  ;;  %v1642_v37 = vld [vmem:[#allocation8 + $0x140] sm:$0xff] }
  0xd3   :  { %vm1781_vm0 = vcmp.gt.f32.partialorder %v2187_v63, 0.0  ;;  %v1798_v48 = vsel %vm1782_vm11, 1.0, %v3807_v5  ;;  %vm1780_vm12 = vcmp.gt.f32.partialorder %v2186_v41, 0.0  ;;  %v2189_v56 = vadd.f32 -1.0, %v1719_v43 }
  0xd4   :  { %v1797_v14 = vsel %vm1781_vm0, 1.0, %v3807_v5  ;;  %v1814_v53 = vsub.f32 1.0, %v1798_v48  ;;  %v1846_v49 = vmul.f32 0.0, %v1798_v48  ;;  %1894 = vst [vmem:[#allocation10 + $0x18] sm:$0xff] %v1798_v48  ;;  %v1796_v12 = vsel %vm1780_vm12, 1.0, %v3807_v5 }
  0xd5   :  { %v1813_v54 = vsub.f32 1.0, %v1797_v14  ;;  %v1845_v36 = vmul.f32 0.0, %v1797_v14  ;;  %1893 = vst [vmem:[#allocation10 + $0x10] sm:$0xff] %v1797_v14  ;;  %v1812_v21 = vsub.f32 1.0, %v1796_v12  ;;  %v1844_v6 = vmul.f32 0.0, %v1796_v12  ;;  %1892 = vst [vmem:[#allocation10 + $0x8] sm:$0xff] %v1796_v12 }
  0xd6   :  { %v1830_v3 = vmul.f32 %v1814_v53, %v1718_v29  ;;  %v1859_v57 = vadd.f32 %v1843_v33, %v1827_v52  ;;  %vm1785_vm13 = vcmp.gt.f32.partialorder %v2191_v20, 0.0  ;;  %vm1783_vm3 = vcmp.gt.f32.partialorder %v2189_v56, 0.0  ;;  %v3536_v53 = vld [vmem:[#allocation8 + $0x1d8] sm:$0xff] }
  0xd7   :  { %v1829_v27 = vmul.f32 %v1813_v54, %v1717_v44  ;;  %v1828_v51 = vmul.f32 %v1812_v21, %v1716_v19  ;;  %v1801_v26 = vsel %vm1785_vm13, 1.0, %v3807_v5  ;;  %v1706_v44 = vmul.f32 0.1, %v1690_v34  ;;  %v1645_v19 = vld [vmem:[#allocation8 + $0x158] sm:$0xff] }
  0xd8   :  { %v1862_v2 = vadd.f32 %v1846_v49, %v1830_v3  ;;  %1941 = vst [vmem:[#allocation11 + $0x100] sm:$0xff] %v1859_v57  ;;  %v1817_v50 = vsub.f32 1.0, %v1801_v26  ;;  %v1849_v30 = vmul.f32 0.0, %v1801_v26  ;;  %1897 = vst [vmem:[#allocation10 + $0x30] sm:$0xff] %v1801_v26  ;;  %v1799_v62 = vsel %vm1783_vm3, 1.0, %v3807_v5 }
  0xd9   :  { %v1861_v8 = vadd.f32 %v1845_v36, %v1829_v27  ;;  %v1860_v23 = vadd.f32 %v1844_v6, %v1828_v51  ;;  %v1677_v63 = vsub.f32 0.0, %v1644_v24  ;;  %v1815_v39 = vsub.f32 1.0, %v1799_v62  ;;  %1895 = vst [vmem:[#allocation10 + $0x20] sm:$0xff] %v1799_v62  ;;  %v3540_v6 = vld [vmem:[#allocation8 + $0x1c8] sm:$0xff]  ;;  %v1648_v51 = vld [vmem:[#allocation8 + $0x170] sm:$0xff] }
  0xda   :  { %1944 = vst [vmem:[#allocation11 + $0x118] sm:$0xff] %v1862_v2  ;;  %v1833_v38 = vmul.f32 %v1817_v50, %v1721_v22  ;;  %v1847_v17 = vmul.f32 0.0, %v1799_v62  ;;  %v1722_v29 = vadd.f32 %v1706_v44, %v1641_v40  ;;  %v1688_v28 = vadd.f32 %v1672_v11, %v3527_v4 }
  0xdb   :  { %1943 = vst [vmem:[#allocation11 + $0x110] sm:$0xff] %v1861_v8  ;;  %1942 = vst [vmem:[#allocation11 + $0x108] sm:$0xff] %v1860_v23  ;;  %v1693_v7 = vadd.f32 %v1677_v63, %v3530_v35  ;;  %v1831_v1 = vmul.f32 %v1815_v39, %v1719_v43  ;;  %v1675_v41 = vsub.f32 0.0, %v1642_v37  ;;  %v1678_v10 = vsub.f32 0.0, %v1645_v19  ;;  %v3545_v63 = vld [vmem:[#allocation8 + $0x1f0] sm:$0xff] }
  0xdc   :  { %v1865_v14 = vadd.f32 %v1849_v30, %v1833_v38  ;;  %v2192_v54 = vadd.f32 -1.0, %v1722_v29  ;;  %v1704_v36 = vmul.f32 0.1, %v1688_v28  ;;  %v1676_v27 = vsub.f32 0.0, %v1643_v55  ;;  %v1646_v28 = vld [vmem:[#allocation8 + $0x160] sm:$0xff] }
  0xdd   :  { %v1709_v32 = vmul.f32 0.1, %v1693_v7  ;;  %v1863_v13 = vadd.f32 %v1847_v17, %v1831_v1  ;;  %v1691_v48 = vadd.f32 %v1675_v41, %v3533_v31  ;;  %v1694_v40 = vadd.f32 %v1678_v10, %v3536_v53  ;;  %v3550_v10 = vld [vmem:[#allocation8 + $0x1e0] sm:$0xff] }
  0xde   :  { %1947 = vst [vmem:[#allocation11 + $0x130] sm:$0xff] %v1865_v14  ;;  %vm1786_vm1 = vcmp.gt.f32.partialorder %v2192_v54, 0.0  ;;  %v1720_v33 = vadd.f32 %v1704_v36, %v1639_v58  ;;  %v1692_v43 = vadd.f32 %v1676_v27, %v3540_v6  ;;  %v1681_v38 = vsub.f32 0.0, %v1648_v51  ;;  %v1649_v54 = vld [vmem:[#allocation8 + $0x178] sm:$0xff] }
  0xdf   :  { %v1802_v49 = vsel %vm1786_vm1, 1.0, %v3807_v5  ;;  %v1725_v22 = vadd.f32 %v1709_v32, %v1644_v24  ;;  %1945 = vst [vmem:[#allocation11 + $0x120] sm:$0xff] %v1863_v13  ;;  %v1707_v42 = vmul.f32 0.1, %v1691_v48  ;;  %v1710_v21 = vmul.f32 0.1, %v1694_v40 }
  0xe0   :  { %v1818_v8 = vsub.f32 1.0, %v1802_v49  ;;  %v1850_v52 = vmul.f32 0.0, %v1802_v49  ;;  %1898 = vst [vmem:[#allocation10 + $0x38] sm:$0xff] %v1802_v49  ;;  %v2190_v12 = vadd.f32 -1.0, %v1720_v33  ;;  %v1708_v11 = vmul.f32 0.1, %v1692_v43 }
  0xe1   :  { %v2195_v3 = vadd.f32 -1.0, %v1725_v22  ;;  %v1723_v57 = vadd.f32 %v1707_v42, %v1642_v37  ;;  %v1726_v2 = vadd.f32 %v1710_v21, %v1645_v19  ;;  %v1697_v32 = vadd.f32 %v1681_v38, %v3545_v63  ;;  %v3552_v48 = vld [vmem:[#allocation8 + $0x1f8] sm:$0xff] }
  0xe2   :  { %v1834_v20 = vmul.f32 %v1818_v8, %v1722_v29  ;;  %vm1784_vm5 = vcmp.gt.f32.partialorder %v2190_v12, 0.0  ;;  %v1724_v29 = vadd.f32 %v1708_v11, %v1643_v55  ;;  %v1682_v49 = vsub.f32 0.0, %v1649_v54 }
  0xe3   :  { %v1800_v59 = vsel %vm1784_vm5, 1.0, %v3807_v5  ;;  %vm1789_vm9 = vcmp.gt.f32.partialorder %v2195_v3, 0.0  ;;  %v2193_v50 = vadd.f32 -1.0, %v1723_v57  ;;  %v2196_v30 = vadd.f32 -1.0, %v1726_v2 }
  0xe4   :  { %v1866_v58 = vadd.f32 %v1850_v52, %v1834_v20  ;;  %v1816_v26 = vsub.f32 1.0, %v1800_v59  ;;  %v1848_v56 = vmul.f32 0.0, %v1800_v59  ;;  %1896 = vst [vmem:[#allocation10 + $0x28] sm:$0xff] %v1800_v59  ;;  %v1805_v34 = vsel %vm1789_vm9, 1.0, %v3807_v5  ;;  %v3556_v20 = vld [vmem:[#allocation8 + $0x1e8] sm:$0xff] }
  0xe5   :  { %v1821_v24 = vsub.f32 1.0, %v1805_v34  ;;  %v1853_v23 = vmul.f32 0.0, %v1805_v34  ;;  %1901 = vst [vmem:[#allocation10 + $0x50] sm:$0xff] %v1805_v34  ;;  %vm1787_vm4 = vcmp.gt.f32.partialorder %v2193_v50, 0.0  ;;  %vm1790_vm10 = vcmp.gt.f32.partialorder %v2196_v30, 0.0 }
  0xe6   :  { %1948 = vst [vmem:[#allocation11 + $0x138] sm:$0xff] %v1866_v58  ;;  %v1832_v44 = vmul.f32 %v1816_v26, %v1720_v33  ;;  %v1803_v39 = vsel %vm1787_vm4, 1.0, %v3807_v5  ;;  %v1806_v17 = vsel %vm1790_vm10, 1.0, %v3807_v5  ;;  %v2194_v41 = vadd.f32 -1.0, %v1724_v29 }
  0xe7   :  { %v1837_v62 = vmul.f32 %v1821_v24, %v1725_v22  ;;  %v1819_v14 = vsub.f32 1.0, %v1803_v39  ;;  %v1851_v7 = vmul.f32 0.0, %v1803_v39  ;;  %1899 = vst [vmem:[#allocation10 + $0x40] sm:$0xff] %v1803_v39  ;;  %v1822_v1 = vsub.f32 1.0, %v1806_v17  ;;  %1902 = vst [vmem:[#allocation10 + $0x58] sm:$0xff] %v1806_v17  ;;  %v1647_v22 = vld [vmem:[#allocation8 + $0x168] sm:$0xff] }
  0xe8   :  { %v1864_v37 = vadd.f32 %v1848_v56, %v1832_v44  ;;  %v1854_v36 = vmul.f32 0.0, %v1806_v17  ;;  %v1679_v33 = vsub.f32 0.0, %v1646_v28  ;;  %vm1788_vm7 = vcmp.gt.f32.partialorder %v2194_v41, 0.0 }
  0xe9   :  { %v1869_v19 = vadd.f32 %v1853_v23, %v1837_v62  ;;  %v1835_v27 = vmul.f32 %v1819_v14, %v1723_v57  ;;  %v1838_v13 = vmul.f32 %v1822_v1, %v1726_v2  ;;  %v1713_v55 = vmul.f32 0.1, %v1697_v32 }
  0xea   :  { %1946 = vst [vmem:[#allocation11 + $0x128] sm:$0xff] %v1864_v37  ;;  %v1804_v52 = vsel %vm1788_vm7, 1.0, %v3807_v5  ;;  %v1695_v12 = vadd.f32 %v1679_v33, %v3550_v10  ;;  %v1698_v43 = vadd.f32 %v1682_v49, %v3552_v48  ;;  %v1680_v59 = vsub.f32 0.0, %v1647_v22 }
  0xeb   :  { %1951 = vst [vmem:[#allocation11 + $0x150] sm:$0xff] %v1869_v19  ;;  %v1867_v40 = vadd.f32 %v1851_v7, %v1835_v27  ;;  %v1870_v8 = vadd.f32 %v1854_v36, %v1838_v13  ;;  %v1820_v42 = vsub.f32 1.0, %v1804_v52  ;;  %v1852_v3 = vmul.f32 0.0, %v1804_v52  ;;  %1900 = vst [vmem:[#allocation10 + $0x48] sm:$0xff] %v1804_v52  ;;  %v2486_v27 = vld [vmem:[#allocation8 + $0x80] sm:$0xff] }
  0xec   :  { %v1729_v21 = vadd.f32 %v1713_v55, %v1648_v51  ;;  %v1711_v57 = vmul.f32 0.1, %v1695_v12  ;;  %v1714_v56 = vmul.f32 0.1, %v1698_v43  ;;  %v1696_v34 = vadd.f32 %v1680_v59, %v3556_v20 }
  0xed   :  { %1949 = vst [vmem:[#allocation11 + $0x140] sm:$0xff] %v1867_v40  ;;  %1952 = vst [vmem:[#allocation11 + $0x158] sm:$0xff] %v1870_v8  ;;  %v1836_v2 = vmul.f32 %v1820_v42, %v1724_v29  ;;  %v510_v37 = vsub.s32 0, %v2772_v9  ;;  %v3566_v29 = vld [vmem:[%s3720_s3] sm:$0x3]  ;;  %s2603_s3 = scalar_lea.vmem %s3569_s8, 2048 }
  0xee   :  { %v2199_v58 = vadd.f32 -1.0, %v1729_v21  ;;  %v1727_v26 = vadd.f32 %v1711_v57, %v1646_v28  ;;  %v1730_v51 = vadd.f32 %v1714_v56, %v1649_v54  ;;  %v1712_v30 = vmul.f32 0.1, %v1696_v34  ;;  %p2604_p4 = scmp.ne.s32.totalorder %s3569_s8, %s2603_s3  ;;  %p2609_p6 = scmp.lt.s32.totalorder %s2603_s3, %s2603_s3 }
  0xef   :  { %v1868_v24 = vadd.f32 %v1852_v3, %v1836_v2  ;;  %v3572_v32 = vrot.slane %v3566_v29, %v510_v37  ;;  %v947_v13 = vmul.f32 0.2, %v2486_v27 }
  0xf0   :  { %vm1793_vm2 = vcmp.gt.f32.partialorder %v2199_v58, 0.0  ;;  %v2197_v50 = vadd.f32 -1.0, %v1727_v26  ;;  %v2200_v38 = vadd.f32 -1.0, %v1730_v51  ;;  %v1728_v62 = vadd.f32 %v1712_v30, %v1647_v22  ;;  %p2610_p7 = por %p2609_p6, %p2608_p5 }
  0xf1   :  { %v1809_v23 = vsel %vm1793_vm2, 1.0, %v3807_v5  ;;  %1950 = vst [vmem:[#allocation11 + $0x148] sm:$0xff] %v1868_v24 }
  0xf2   :  { %v1825_v44 = vsub.f32 1.0, %v1809_v23  ;;  %v1857_v11 = vmul.f32 0.0, %v1809_v23  ;;  %1905 = vst [vmem:[#allocation10 + $0x70] sm:$0xff] %v1809_v23  ;;  %vm1791_vm14 = vcmp.gt.f32.partialorder %v2197_v50, 0.0  ;;  %vm1794_vm6 = vcmp.gt.f32.partialorder %v2200_v38, 0.0  ;;  %p2611_p8 = pnand %p2610_p7, %p2604_p4 }
  0xf3   :  { %v1807_v17 = vsel %vm1791_vm14, 1.0, %v3807_v5  ;;  %v2198_v14 = vadd.f32 -1.0, %v1728_v62  ;;  %v1810_v1 = vsel %vm1794_vm6, 1.0, %v3807_v5 }
  0xf4   :  { %v1841_v39 = vmul.f32 %v1825_v44, %v1729_v21  ;;  %v1823_v28 = vsub.f32 1.0, %v1807_v17  ;;  %v1855_v19 = vmul.f32 0.0, %v1807_v17  ;;  %1903 = vst [vmem:[#allocation10 + $0x60] sm:$0xff] %v1807_v17  ;;  %v1826_v36 = vsub.f32 1.0, %v1810_v1  ;;  %1906 = vst [vmem:[#allocation10 + $0x78] sm:$0xff] %v1810_v1 }
  0xf5   :  { %v1858_v41 = vmul.f32 0.0, %v1810_v1  ;;  %vm1792_vm8 = vcmp.gt.f32.partialorder %v2198_v14, 0.0 }
  0xf6   :  { %v1873_v7 = vadd.f32 %v1857_v11, %v1841_v39  ;;  %v1839_v54 = vmul.f32 %v1823_v28, %v1727_v26  ;;  %v1808_v33 = vsel %vm1792_vm8, 1.0, %v3807_v5  ;;  %v1842_v40 = vmul.f32 %v1826_v36, %v1730_v51 }
  0xf7   :  { %v1824_v8 = vsub.f32 1.0, %v1808_v33  ;;  %v1856_v52 = vmul.f32 0.0, %v1808_v33  ;;  %1904 = vst [vmem:[#allocation10 + $0x68] sm:$0xff] %v1808_v33 }
  0xf8   :  { %1955 = vst [vmem:[#allocation11 + $0x170] sm:$0xff] %v1873_v7  ;;  %v1871_v22 = vadd.f32 %v1855_v19, %v1839_v54 }
 0x140   :  { %v2217_v55 = vpop.f32.mrb[0].mxu0  ;;  %v2379_v49 = vpop.f32.mrb[0].mxu1 }
 0x141   :  { %v2218_v12 = vpop.f32.mrb[1].mxu0  ;;  %v787_v42 = vpop.f32.mrb[1].mxu1 }
 0x142   :  { %2614 = shalt.err (!%p2611_p8)
}
 0x143   :  { %s2615_s28 = scalar_lea.hbm %s3722_s5, 2048 }
 0x144   :  { %p2616_p9 = scmp.ne.s32.totalorder %s3722_s5, %s2615_s28  ;;  %p2619_p10 = scmp.lt.u32.totalorder %s2615_s28, %s3722_s5 }
 0x146   :  { %p2621_p11 = pnand %p2619_p10, %p2616_p9 }
 0x148   :  { %2624 = shalt.err (!%p2621_p11)
}
 0x149   :  { %1985 = dma.vmem_to_hbm [thread:$0]  %s3569_s8, 2048, %s3722_s5, [#allocation4], %s2661_s1, %s2661_s1, %s2662_s21   ;;  %v2219_v5 = vadd.f32 %v2218_v12, %v2217_v55  ;;  %v2220_v3 = vpop.f32.mrb[2].mxu0  ;;  %v2380_v21 = vpop.f32.mrb[2].mxu1  ;;  %v2487_v57 = vld [vmem:[#allocation8 + $0x88] sm:$0xff]  ;;  %1953 = vst [vmem:[#allocation11 + $0x160] sm:$0xff] %v1871_v22  ;;  %v1874_v59 = vadd.f32 %v1858_v41, %v1842_v40  ;;  %v1840_v2 = vmul.f32 %v1824_v8, %v1728_v62  ;;  %v963_v34 = vsub.f32 %v2486_v27, %v947_v13 }
 0x14a   :  { %v948_v43 = vmul.f32 0.2, %v2487_v57  ;;  %v2221_v58 = vpop.f32.mrb[3].mxu0  ;;  %v790_v26 = vpop.f32.mrb[3].mxu1  ;;  %v2488_v39 = vld [vmem:[#allocation8 + $0x90] sm:$0xff]  ;;  %v2489_v54 = vld [vmem:[#allocation8 + $0x98] sm:$0xff] }
 0x14b   :  { %v691_v56 = vadd.f32 %v2219_v5, %v3572_v32  ;;  %v2222_v24 = vadd.f32 %v2221_v58, %v2220_v3  ;;  %1956 = vst [vmem:[#allocation11 + $0x178] sm:$0xff] %v1874_v59  ;;  %v1872_v23 = vadd.f32 %v1856_v52, %v1840_v2  ;;  %v2223_v38 = vpop.f32.mrb[4].mxu0  ;;  %v3597_v37 = vpop.f32.mrb[4].mxu1  ;;  %v949_v62 = vmul.f32 0.2, %v2488_v39  ;;  %v2490_v3 = vld [vmem:[#allocation8 + $0xa0] sm:$0xff] }
 0x14c   :  { %v964_v30 = vsub.f32 %v2487_v57, %v948_v43  ;;  %v2224_v17 = vpop.f32.mrb[5].mxu0  ;;  %v803_v28 = vpop.f32.mrb[5].mxu1  ;;  %v950_v36 = vmul.f32 0.2, %v2489_v54  ;;  %v951_v57 = vmul.f32 0.2, %v2490_v3 }
 0x14d   :  { %v788_v50 = vadd.f32 %v787_v42, %v691_v56  ;;  %v694_v51 = vadd.f32 %v2222_v24, %v3572_v32  ;;  %1954 = vst [vmem:[#allocation11 + $0x168] sm:$0xff] %v1872_v23  ;;  %v2225_v14 = vadd.f32 %v2224_v17, %v2223_v38  ;;  %v2226_v7 = vpop.f32.mrb[6].mxu0  ;;  %v2384_v1 = vpop.f32.mrb[6].mxu1  ;;  %v965_v33 = vsub.f32 %v2488_v39, %v949_v62  ;;  %s2669_s5 = smov [#allocation11]  }
 0x14e   :  { %v2227_v41 = vpop.f32.mrb[7].mxu0  ;;  %v806_v27 = vpop.f32.mrb[7].mxu1  ;;  %v966_v8 = vsub.f32 %v2489_v54, %v950_v36  ;;  %s1991_s0 = sshll.u32 %s2669_s5, 4  ;;  %s1992_s0 = int_to_ptr.vmem [resolvable:$true] %s1991_s0 }
 0x14f   :  { %v1091_v44 = vadd.f32 %v963_v34, %v788_v50  ;;  %v791_v11 = vadd.f32 %v790_v26, %v694_v51  ;;  %v699_v13 = vadd.f32 %v2225_v14, %v3572_v32  ;;  %v2228_v55 = vadd.f32 %v2227_v41, %v2226_v7  ;;  %v2491_v34 = vld [vmem:[#allocation8 + $0xa8] sm:$0xff]  ;;  %s2625_s12 = scalar_lea.vmem %s1992_s0, 8192  ;;  %p2630_p13 = scmp.lt.s32.totalorder %s1992_s0, %s1992_s0 }
 0x150   :  { %v2229_v42 = vpop.f32.mrb[8].mxu0  ;;  %v3601_v5 = vpop.f32.mrb[8].mxu1  ;;  %v967_v50 = vsub.f32 %v2490_v3, %v951_v57  ;;  %p2626_p12 = scmp.ne.s32.totalorder %s1992_s0, %s2625_s12  ;;  %p2631_p0 = scmp.lt.s32.totalorder %s2625_s12, %s2625_s12 }
 0x151   :  { %1924 = vst [vmem:[#allocation11 + $0x80] sm:$0xff] %v1091_v44  ;;  %v1092_v19 = vadd.f32 %v964_v30, %v791_v11  ;;  %v796_v22 = vadd.f32 %v2379_v49, %v699_v13  ;;  %v702_v40 = vadd.f32 %v2228_v55, %v3572_v32  ;;  %v2230_v43 = vpop.f32.mrb[9].mxu0  ;;  %v819_v59 = vpop.f32.mrb[9].mxu1  ;;  %v952_v49 = vmul.f32 0.2, %v2491_v34 }
 0x152   :  { %v2231_v58 = vadd.f32 %v2230_v43, %v2229_v42  ;;  %v2232_v26 = vpop.f32.mrb[10].mxu0  ;;  %v3603_v56 = vpop.f32.mrb[10].mxu1  ;;  %p2632_p1 = por %p2631_p0, %p2630_p13 }
 0x153   :  { %1925 = vst [vmem:[#allocation11 + $0x88] sm:$0xff] %v1092_v19  ;;  %v1093_v52 = vadd.f32 %v965_v33, %v796_v22  ;;  %v799_v12 = vadd.f32 %v2380_v21, %v702_v40  ;;  %v2233_v24 = vpop.f32.mrb[11].mxu0  ;;  %v822_v23 = vpop.f32.mrb[11].mxu1  ;;  %v968_v11 = vsub.f32 %v2491_v34, %v952_v49  ;;  %v2492_v19 = vld [vmem:[#allocation8 + $0xb0] sm:$0xff] }
 0x154   :  { %v707_v21 = vadd.f32 %v2231_v58, %v3572_v32  ;;  %v2234_v51 = vadd.f32 %v2233_v24, %v2232_v26  ;;  %v953_v14 = vmul.f32 0.2, %v2492_v19  ;;  %v2494_v58 = vld [vmem:[#allocation8 + $0xc0] sm:$0xff]  ;;  %p2633_p2 = pnand %p2632_p1, %p2626_p12 }
 0x155   :  { %1926 = vst [vmem:[#allocation11 + $0x90] sm:$0xff] %v1093_v52  ;;  %v1094_v2 = vadd.f32 %v966_v8, %v799_v12  ;;  %v955_v26 = vmul.f32 0.2, %v2494_v58 }
 0x156   :  { %v804_v30 = vadd.f32 %v803_v28, %v707_v21  ;;  %v710_v44 = vadd.f32 %v2234_v51, %v3572_v32  ;;  %v2493_v28 = vld [vmem:[#allocation8 + $0xb8] sm:$0xff]  ;;  %v969_v8 = vsub.f32 %v2492_v19, %v953_v14 }
 0x157   :  { %1927 = vst [vmem:[#allocation11 + $0x98] sm:$0xff] %v1094_v2  ;;  %v954_v55 = vmul.f32 0.2, %v2493_v28 }
 0x158   :  { %v1095_v38 = vadd.f32 %v967_v50, %v804_v30  ;;  %v807_v39 = vadd.f32 %v806_v27, %v710_v44  ;;  %v2235_v62 = vpop.f32.mrb[12].mxu0  ;;  %v3607_v17 = vpop.f32.mrb[12].mxu1  ;;  %v2495_v50 = vld [vmem:[#allocation8 + $0xc8] sm:$0xff] }
 0x159   :  { %v2236_v7 = vpop.f32.mrb[13].mxu0  ;;  %v3609_v54 = vpop.f32.mrb[13].mxu1  ;;  %v970_v3 = vsub.f32 %v2493_v28, %v954_v55  ;;  %v956_v51 = vmul.f32 0.2, %v2495_v50  ;;  %v2496_v28 = vld [vmem:[#allocation8 + $0xd0] sm:$0xff] }
 0x15a   :  { %1928 = vst [vmem:[#allocation11 + $0xa0] sm:$0xff] %v1095_v38  ;;  %v1096_v36 = vadd.f32 %v968_v11, %v807_v39  ;;  %v2237_v41 = vadd.f32 %v2236_v7, %v2235_v62  ;;  %v2238_v13 = vpop.f32.mrb[14].mxu0  ;;  %v3611_v33 = vpop.f32.mrb[14].mxu1  ;;  %v957_v55 = vmul.f32 0.2, %v2496_v28 }
 0x15b   :  { %v2239_v22 = vpop.f32.mrb[15].mxu0  ;;  %v3613_v40 = vpop.f32.mrb[15].mxu1  ;;  %v972_v62 = vsub.f32 %v2495_v50, %v956_v51 }
 0x15c   :  { %1929 = vst [vmem:[#allocation11 + $0xa8] sm:$0xff] %v1096_v36  ;;  %v715_v27 = vadd.f32 %v2237_v41, %v3572_v32  ;;  %v2240_v52 = vadd.f32 %v2239_v22, %v2238_v13 }
 0x15e   :  { %v812_v12 = vadd.f32 %v3597_v37, %v715_v27  ;;  %v718_v42 = vadd.f32 %v2240_v52, %v3572_v32  ;;  %v971_v37 = vsub.f32 %v2494_v58, %v955_v26 }
 0x160   :  { %v1097_v57 = vadd.f32 %v969_v8, %v812_v12  ;;  %v815_v43 = vadd.f32 %v2384_v1, %v718_v42  ;;  %v2241_v2 = vpop.f32.mrb[16].mxu0  ;;  %v2497_v42 = vld [vmem:[#allocation8 + $0xd8] sm:$0xff] }
 0x161   :  { %v2242_v34 = vpop.f32.mrb[17].mxu0 }
 0x162   :  { %1930 = vst [vmem:[#allocation11 + $0xb0] sm:$0xff] %v1097_v57  ;;  %v1098_v49 = vadd.f32 %v970_v3, %v815_v43  ;;  %v2243_v24 = vadd.f32 %v2242_v34, %v2241_v2  ;;  %v2244_v21 = vpop.f32.mrb[18].mxu0  ;;  %v958_v3 = vmul.f32 0.2, %v2497_v42  ;;  %v973_v2 = vsub.f32 %v2496_v28, %v957_v55 }
 0x163   :  { %v2245_v30 = vpop.f32.mrb[19].mxu0 }
 0x164   :  { %1931 = vst [vmem:[#allocation11 + $0xb8] sm:$0xff] %v1098_v49  ;;  %v723_v44 = vadd.f32 %v2243_v24, %v3572_v32  ;;  %v2246_v11 = vadd.f32 %v2245_v30, %v2244_v21  ;;  %v974_v49 = vsub.f32 %v2497_v42, %v958_v3 }
 0x165   :  { %v2297_v38 = vpop.f32.mrb[16].mxu1 }
 0x166   :  { %v820_v39 = vadd.f32 %v819_v59, %v723_v44  ;;  %v726_v1 = vadd.f32 %v2246_v11, %v3572_v32  ;;  %v2298_v19 = vpop.f32.mrb[17].mxu1 }
 0x167   :  { %v3620_v7 = vadd.f32 %v2298_v19, %v2297_v38  ;;  %v2300_v36 = vpop.f32.mrb[18].mxu1 }
 0x168   :  { %v1099_v14 = vadd.f32 %v971_v37, %v820_v39  ;;  %v823_v41 = vadd.f32 %v822_v23, %v726_v1  ;;  %v2247_v13 = vpop.f32.mrb[20].mxu0  ;;  %v2301_v22 = vpop.f32.mrb[19].mxu1  ;;  %v959_v37 = vmul.f32 0.2, %v3425_v61 }
 0x169   :  { %v2248_v27 = vpop.f32.mrb[21].mxu0  ;;  %v3622_v52 = vadd.f32 %v2301_v22, %v2300_v36 }
 0x16a   :  { %1932 = vst [vmem:[#allocation11 + $0xc0] sm:$0xff] %v1099_v14  ;;  %v1100_v8 = vadd.f32 %v972_v62, %v823_v41  ;;  %v2249_v12 = vadd.f32 %v2248_v27, %v2247_v13  ;;  %v2250_v59 = vpop.f32.mrb[22].mxu0  ;;  %v975_v41 = vsub.f32 %v3425_v61, %v959_v37  ;;  %v961_v61 = vmul.f32 0.2, %v3443_v60 }
 0x16b   :  { %v2251_v57 = vpop.f32.mrb[23].mxu0 }
 0x16c   :  { %1933 = vst [vmem:[#allocation11 + $0xc8] sm:$0xff] %v1100_v8  ;;  %v731_v43 = vadd.f32 %v2249_v12, %v3572_v32  ;;  %v2252_v58 = vadd.f32 %v2251_v57, %v2250_v59  ;;  %v1277_v8 = vsub.s32 1, %v2772_v9 }
 0x16d   :  { %v2303_v23 = vpop.f32.mrb[20].mxu1 }
 0x16e   :  { %v828_v26 = vadd.f32 %v3601_v5, %v731_v43  ;;  %v734_v34 = vadd.f32 %v2252_v58, %v3572_v32  ;;  %v2304_v24 = vpop.f32.mrb[21].mxu1  ;;  %v960_v5 = vmul.f32 0.2, %v3432_v47 }
 0x16f   :  { %v2305_v50 = vadd.f32 %v2304_v24, %v2303_v23  ;;  %v2306_v51 = vpop.f32.mrb[22].mxu1  ;;  %v977_v24 = vsub.f32 %v3443_v60, %v961_v61  ;;  %v1732_v60 = vmul.f32 0.2, %v3509_v18 }
 0x170   :  { %v1101_v21 = vadd.f32 %v973_v2, %v828_v26  ;;  %v831_v30 = vadd.f32 %v3603_v56, %v734_v34  ;;  %v2253_v44 = vpop.f32.mrb[24].mxu0  ;;  %v2307_v11 = vpop.f32.mrb[23].mxu1  ;;  %v976_v22 = vsub.f32 %v3432_v47, %v960_v5  ;;  %v2498_v26 = vld [vmem:[#allocation8 + $0xf8] sm:$0xff] }
 0x171   :  { %v2254_v38 = vpop.f32.mrb[25].mxu0  ;;  %v2308_v1 = vadd.f32 %v2307_v11, %v2306_v51  ;;  %v962_v34 = vmul.f32 0.2, %v2498_v26  ;;  %v1733_v51 = vmul.f32 0.2, %v3500_v0 }
 0x172   :  { %1934 = vst [vmem:[#allocation11 + $0xd0] sm:$0xff] %v1101_v21  ;;  %v1102_v39 = vadd.f32 %v974_v49, %v831_v30  ;;  %v2255_v62 = vadd.f32 %v2254_v38, %v2253_v44  ;;  %v2256_v19 = vpop.f32.mrb[26].mxu0  ;;  %v3645_v21 = vrot.slane %v3566_v29, %v1277_v8  ;;  %v1731_v30 = vmul.f32 0.2, %v3503_v46 }
 0x173   :  { %v2257_v14 = vpop.f32.mrb[27].mxu0  ;;  %v978_v38 = vsub.f32 %v2498_v26, %v962_v34 }
 0x174   :  { %1935 = vst [vmem:[#allocation11 + $0xd8] sm:$0xff] %v1102_v39  ;;  %v739_v36 = vadd.f32 %v2255_v62, %v3572_v32  ;;  %v2258_v13 = vadd.f32 %v2257_v14, %v2256_v19  ;;  %v1466_v62 = vadd.f32 %v2305_v50, %v3645_v21  ;;  %v1734_v19 = vmul.f32 0.2, %v3506_v25 }
 0x175   :  { %v1747_v50 = vsub.f32 %v3503_v46, %v1731_v30 }
 0x176   :  { %v2309_v56 = vpop.f32.mrb[24].mxu1  ;;  %v836_v28 = vadd.f32 %v3609_v54, %v739_v36  ;;  %v742_v55 = vadd.f32 %v2258_v13, %v3572_v32  ;;  %v1458_v13 = vadd.f32 %v3620_v7, %v3645_v21 }
 0x177   :  { %v2310_v27 = vpop.f32.mrb[25].mxu1 }
 0x178   :  { %v1103_v12 = vadd.f32 %v975_v41, %v836_v28  ;;  %v3636_v59 = vadd.f32 %v2310_v27, %v2309_v56  ;;  %v2312_v42 = vpop.f32.mrb[26].mxu1  ;;  %v839_v3 = vadd.f32 %v3613_v40, %v742_v55  ;;  %v2259_v57 = vpop.f32.mrb[28].mxu0  ;;  %v1469_v55 = vadd.f32 %v2308_v1, %v3645_v21 }
 0x179   :  { %v2313_v43 = vpop.f32.mrb[27].mxu1  ;;  %v2260_v2 = vpop.f32.mrb[29].mxu0  ;;  %v1748_v1 = vsub.f32 %v3509_v18, %v1732_v60 }
 0x17a   :  { %1936 = vst [vmem:[#allocation11 + $0xe0] sm:$0xff] %v1103_v12  ;;  %v1104_v54 = vadd.f32 %v976_v22, %v839_v3  ;;  %v3640_v58 = vadd.f32 %v2313_v43, %v2312_v42  ;;  %v2261_v23 = vadd.f32 %v2260_v2, %v2259_v57  ;;  %v2262_v47 = vpop.f32.mrb[30].mxu0  ;;  %v2499_v42 = vld [vmem:[#allocation2 + $0x10] sm:$0xff]  ;;  %v1750_v57 = vsub.f32 %v3506_v25, %v1734_v19 }
 0x17b   :  { %v2263_v9 = vpop.f32.mrb[31].mxu0 }
 0x17c   :  { %1937 = vst [vmem:[#allocation11 + $0xe8] sm:$0xff] %v1104_v54  ;;  %v747_v49 = vadd.f32 %v2261_v23, %v3572_v32  ;;  %v2264_v40 = vadd.f32 %v2263_v9, %v2262_v47  ;;  %v2501_v54 = vld [vmem:[#allocation2 + $0x18] sm:$0xff]  ;;  %v1737_v47 = vmul.f32 0.2, %v3512_v16 }
 0x17e   :  { %v2315_v44 = vpop.f32.mrb[28].mxu1  ;;  %v844_v37 = vadd.f32 %v3607_v17, %v747_v49  ;;  %v750_v11 = vadd.f32 %v2264_v40, %v3572_v32  ;;  %v1749_v32 = vsub.f32 %v3500_v0, %v1733_v51  ;;  %v2500_v0 = vld [vmem:[#allocation2] sm:$0xff]  ;;  %v1735_v49 = vmul.f32 0.2, %v3516_v15 }
 0x17f   :  { %v2316_v39 = vpop.f32.mrb[29].mxu1  ;;  %v1738_v51 = vmul.f32 0.2, %v3522_v45  ;;  %v1753_v19 = vsub.f32 %v3512_v16, %v1737_v47 }
 0x180   :  { %v1105_v5 = vadd.f32 %v977_v24, %v844_v37  ;;  %v2317_v29 = vadd.f32 %v2316_v39, %v2315_v44  ;;  %v2318_v14 = vpop.f32.mrb[30].mxu1  ;;  %v847_v36 = vadd.f32 %v3611_v33, %v750_v11  ;;  %v2411_v41 = vpop.f32.mrb[32].mxu0  ;;  %v1461_v33 = vadd.f32 %v3622_v52, %v3645_v21  ;;  %v2502_v52 = vld [vmem:[#allocation2 + $0x8] sm:$0xff] }
 0x181   :  { %v2319_v17 = vpop.f32.mrb[31].mxu1  ;;  %v1563_v56 = vadd.f32 %v2411_v41, %v1466_v62  ;;  %v1554_v28 = vpop.f32.mrb[33].mxu0  ;;  %v1474_v11 = vadd.f32 %v3636_v59, %v3645_v21  ;;  %v2503_v59 = vld [vmem:[#allocation2 + $0x30] sm:$0xff] }
 0x182   :  { %1938 = vst [vmem:[#allocation11 + $0xf0] sm:$0xff] %v1105_v5  ;;  %v1106_v22 = vadd.f32 %v978_v38, %v847_v36  ;;  %v2320_v27 = vadd.f32 %v2319_v17, %v2318_v14  ;;  %v1555_v8 = vadd.f32 %v1554_v28, %v1458_v13  ;;  %v2412_v12 = vpop.f32.mrb[34].mxu0  ;;  %v1482_v40 = vadd.f32 %v2317_v29, %v3645_v21 }
 0x183   :  { %v1619_v3 = vadd.f32 %v2499_v42, %v1563_v56  ;;  %v1566_v7 = vadd.f32 %v2412_v12, %v1469_v55  ;;  %v1557_v61 = vpop.f32.mrb[35].mxu0  ;;  %v1736_v38 = vmul.f32 0.2, %v3527_v4  ;;  %v1751_v36 = vsub.f32 %v3516_v15, %v1735_v49  ;;  %v2506_v42 = vld [vmem:[#allocation2 + $0x28] sm:$0xff] }
 0x184   :  { %1939 = vst [vmem:[#allocation11 + $0xf8] sm:$0xff] %v1106_v22  ;;  %v1617_v43 = vadd.f32 %v2500_v0, %v1555_v8  ;;  %v1558_v46 = vadd.f32 %v1557_v61, %v1461_v33  ;;  %v1485_v5 = vadd.f32 %v2320_v27, %v3645_v21  ;;  %v1477_v13 = vadd.f32 %v3640_v58, %v3645_v21  ;;  %v2505_v8 = vld [vmem:[#allocation2 + $0x38] sm:$0xff] }
 0x185   :  { %v1877_v2 = vadd.f32 %v1749_v32, %v1619_v3  ;;  %v1620_v23 = vadd.f32 %v2501_v54, %v1566_v7  ;;  %v1754_v32 = vsub.f32 %v3522_v45, %v1738_v51  ;;  %v1752_v22 = vsub.f32 %v3527_v4, %v1736_v38 }
 0x186   :  { %v2321_v26 = vpop.f32.mrb[32].mxu1  ;;  %v1875_v34 = vadd.f32 %v1747_v50, %v1617_v43  ;;  %v1618_v9 = vadd.f32 %v2502_v52, %v1558_v46  ;;  %v2504_v50 = vld [vmem:[#allocation2 + $0x20] sm:$0xff]  ;;  %v1741_v4 = vmul.f32 0.2, %v3530_v35  ;;  %v1739_v46 = vmul.f32 0.2, %v3533_v31 }
 0x187   :  { %1960 = vst [vmem:[#allocation11 + $0x190] sm:$0xff] %v1877_v2  ;;  %v2322_v25 = vpop.f32.mrb[33].mxu1  ;;  %v1878_v24 = vadd.f32 %v1750_v57, %v1620_v23  ;;  %v1742_v2 = vmul.f32 0.2, %v3536_v53 }
 0x188   :  { %v2323_v30 = vadd.f32 %v2322_v25, %v2321_v26  ;;  %1958 = vst [vmem:[#allocation11 + $0x180] sm:$0xff] %v1875_v34  ;;  %v2324_v18 = vpop.f32.mrb[34].mxu1  ;;  %v1876_v44 = vadd.f32 %v1748_v1, %v1618_v9  ;;  %v1740_v26 = vmul.f32 0.2, %v3540_v6  ;;  %v1757_v52 = vsub.f32 %v3530_v35, %v1741_v4  ;;  %v2508_v35 = vld [vmem:[#allocation2 + $0x40] sm:$0xff] }
 0x189   :  { %1961 = vst [vmem:[#allocation11 + $0x198] sm:$0xff] %v1878_v24  ;;  %v2325_v39 = vpop.f32.mrb[35].mxu1  ;;  %v1755_v51 = vsub.f32 %v3533_v31, %v1739_v46 }
 0x18a   :  { %v2415_v37 = vpop.f32.mrb[36].mxu0  ;;  %v2326_v29 = vadd.f32 %v2325_v39, %v2324_v18  ;;  %1959 = vst [vmem:[#allocation11 + $0x188] sm:$0xff] %v1876_v44  ;;  %v1490_v47 = vadd.f32 %v2323_v30, %v3645_v21  ;;  %v1758_v39 = vsub.f32 %v3536_v53, %v1742_v2  ;;  %v1744_v53 = vmul.f32 0.2, %v3556_v20 }
 0x18b   :  { %v1579_v62 = vadd.f32 %v2415_v37, %v1482_v40  ;;  %v1570_v60 = vpop.f32.mrb[37].mxu0 }
 0x18c   :  { %v1571_v14 = vadd.f32 %v1570_v60, %v1474_v11  ;;  %v2416_v41 = vpop.f32.mrb[38].mxu0  ;;  %v1493_v37 = vadd.f32 %v2326_v29, %v3645_v21  ;;  %v2507_v11 = vld [vmem:[#allocation2 + $0x50] sm:$0xff]  ;;  %v1743_v29 = vmul.f32 0.2, %v3550_v10 }
 0x18d   :  { %v1623_v17 = vadd.f32 %v2503_v59, %v1579_v62  ;;  %v1582_v56 = vadd.f32 %v2416_v41, %v1485_v5  ;;  %v1573_v28 = vpop.f32.mrb[39].mxu0 }
 0x18e   :  { %v1621_v16 = vadd.f32 %v2504_v50, %v1571_v14  ;;  %v1574_v55 = vadd.f32 %v1573_v28, %v1477_v13  ;;  %v2327_v33 = vpop.f32.mrb[36].mxu1  ;;  %v2509_v13 = vld [vmem:[#allocation2 + $0x58] sm:$0xff] }
 0x18f   :  { %v1881_v27 = vadd.f32 %v1753_v19, %v1623_v17  ;;  %v1624_v12 = vadd.f32 %v2505_v8, %v1582_v56  ;;  %v2328_v58 = vpop.f32.mrb[37].mxu1  ;;  %v2510_v17 = vld [vmem:[#allocation2 + $0x48] sm:$0xff] }
 0x190   :  { %v1879_v15 = vadd.f32 %v1751_v36, %v1621_v16  ;;  %v1622_v3 = vadd.f32 %v2506_v42, %v1574_v55  ;;  %v2329_v57 = vadd.f32 %v2328_v58, %v2327_v33  ;;  %v2330_v61 = vpop.f32.mrb[38].mxu1  ;;  %v1756_v36 = vsub.f32 %v3540_v6, %v1740_v26  ;;  %v2513_v26 = vld [vmem:[#allocation2 + $0x70] sm:$0xff] }
 0x191   :  { %1964 = vst [vmem:[#allocation11 + $0x1b0] sm:$0xff] %v1881_v27  ;;  %v1882_v7 = vadd.f32 %v1754_v32, %v1624_v12  ;;  %v2331_v0 = vpop.f32.mrb[39].mxu1  ;;  %v1759_v33 = vsub.f32 %v3550_v10, %v1743_v29 }
 0x192   :  { %1962 = vst [vmem:[#allocation11 + $0x1a0] sm:$0xff] %v1879_v15  ;;  %v1880_v45 = vadd.f32 %v1752_v22, %v1622_v3  ;;  %v2332_v43 = vadd.f32 %v2331_v0, %v2330_v61  ;;  %v1498_v1 = vadd.f32 %v2329_v57, %v3645_v21  ;;  %v1745_v22 = vmul.f32 0.2, %v3545_v63  ;;  %v2511_v0 = vld [vmem:[#allocation2 + $0x60] sm:$0xff] }
 0x193   :  { %1965 = vst [vmem:[#allocation11 + $0x1b8] sm:$0xff] %v1882_v7  ;;  %v1746_v7 = vmul.f32 0.2, %v3552_v48  ;;  %v1760_v61 = vsub.f32 %v3556_v20, %v1744_v53 }
 0x194   :  { %1963 = vst [vmem:[#allocation11 + $0x1a8] sm:$0xff] %v1880_v45  ;;  %v1501_v25 = vadd.f32 %v2332_v43, %v3645_v21 }
 0x195   :  { %v1762_v20 = vsub.f32 %v3552_v48, %v1746_v7 }
 0x199   :  { %v2333_v54 = vpop.f32.mrb[40].mxu1  ;;  %v2419_v23 = vpop.f32.mrb[40].mxu0 }
 0x19a   :  { %v1595_v34 = vadd.f32 %v2419_v23, %v1498_v1  ;;  %v2334_v9 = vpop.f32.mrb[41].mxu1  ;;  %v1586_v49 = vpop.f32.mrb[41].mxu0  ;;  %v1761_v1 = vsub.f32 %v3545_v63, %v1745_v22  ;;  %v2512_v23 = vld [vmem:[#allocation2 + $0x68] sm:$0xff] }
 0x19b   :  { %v2335_v24 = vadd.f32 %v2334_v9, %v2333_v54  ;;  %v1587_v40 = vadd.f32 %v1586_v49, %v1490_v47  ;;  %v2336_v18 = vpop.f32.mrb[42].mxu1  ;;  %v2420_v44 = vpop.f32.mrb[42].mxu0 }
 0x19c   :  { %v1627_v38 = vadd.f32 %v2507_v11, %v1595_v34  ;;  %v1598_v30 = vadd.f32 %v2420_v44, %v1501_v25  ;;  %v2337_v62 = vpop.f32.mrb[43].mxu1  ;;  %v1589_v19 = vpop.f32.mrb[43].mxu0  ;;  %v2514_v25 = vld [vmem:[#allocation2 + $0x78] sm:$0xff] }
 0x19d   :  { %v1625_v60 = vadd.f32 %v2508_v35, %v1587_v40  ;;  %v2338_v5 = vadd.f32 %v2337_v62, %v2336_v18  ;;  %v1590_v14 = vadd.f32 %v1589_v19, %v1493_v37  ;;  %v1506_v55 = vadd.f32 %v2335_v24, %v3645_v21 }
 0x19e   :  { %v1885_v41 = vadd.f32 %v1757_v52, %v1627_v38  ;;  %v1628_v31 = vadd.f32 %v2509_v13, %v1598_v30 }
 0x19f   :  { %v1883_v59 = vadd.f32 %v1755_v51, %v1625_v60  ;;  %v1626_v56 = vadd.f32 %v2510_v17, %v1590_v14  ;;  %v1509_v3 = vadd.f32 %v2338_v5, %v3645_v21 }
 0x1a0   :  { %1968 = vst [vmem:[#allocation11 + $0x1d0] sm:$0xff] %v1885_v41  ;;  %v1886_v32 = vadd.f32 %v1758_v39, %v1628_v31 }
 0x1a1   :  { %1966 = vst [vmem:[#allocation11 + $0x1c0] sm:$0xff] %v1883_v59  ;;  %v1884_v28 = vadd.f32 %v1756_v36, %v1626_v56  ;;  %v2339_v50 = vpop.f32.mrb[44].mxu1  ;;  %v2423_v16 = vpop.f32.mrb[44].mxu0 }
 0x1a2   :  { %1969 = vst [vmem:[#allocation11 + $0x1d8] sm:$0xff] %v1886_v32  ;;  %v2340_v6 = vpop.f32.mrb[45].mxu1  ;;  %v1602_v27 = vpop.f32.mrb[45].mxu0 }
 0x1a3   :  { %1967 = vst [vmem:[#allocation11 + $0x1c8] sm:$0xff] %v1884_v28  ;;  %v2341_v8 = vadd.f32 %v2340_v6, %v2339_v50  ;;  %v1603_v12 = vadd.f32 %v1602_v27, %v1506_v55  ;;  %v2342_v15 = vpop.f32.mrb[46].mxu1  ;;  %v2424_v42 = vpop.f32.mrb[46].mxu0 }
 0x1a4   :  { %v2343_v58 = vpop.f32.mrb[47].mxu1  ;;  %v1605_v57 = vpop.f32.mrb[47].mxu0 }
 0x1a5   :  { %v1514_v45 = vadd.f32 %v2341_v8, %v3645_v21  ;;  %v1629_v43 = vadd.f32 %v2511_v0, %v1603_v12  ;;  %v2344_v4 = vadd.f32 %v2343_v58, %v2342_v15  ;;  %v1606_v46 = vadd.f32 %v1605_v57, %v1509_v3 }
 0x1a7   :  { %v1611_v2 = vadd.f32 %v2423_v16, %v1514_v45  ;;  %v1887_v10 = vadd.f32 %v1759_v33, %v1629_v43  ;;  %v1517_v54 = vadd.f32 %v2344_v4, %v3645_v21  ;;  %v1630_v47 = vadd.f32 %v2512_v23, %v1606_v46 }
 0x1a9   :  { %v1631_v34 = vadd.f32 %v2513_v26, %v1611_v2  ;;  %1970 = vst [vmem:[#allocation11 + $0x1e0] sm:$0xff] %v1887_v10  ;;  %v1614_v52 = vadd.f32 %v2424_v42, %v1517_v54  ;;  %v1888_v9 = vadd.f32 %v1760_v61, %v1630_v47 }
 0x1ab   :  { %v1889_v49 = vadd.f32 %v1761_v1, %v1631_v34  ;;  %v1632_v24 = vadd.f32 %v2514_v25, %v1614_v52  ;;  %1971 = vst [vmem:[#allocation11 + $0x1e8] sm:$0xff] %v1888_v9 }
 0x1ad   :  { %1972 = vst [vmem:[#allocation11 + $0x1f0] sm:$0xff] %v1889_v49  ;;  %v1890_v63 = vadd.f32 %v1762_v20, %v1632_v24 }
 0x1af   :  { %1973 = vst [vmem:[#allocation11 + $0x1f8] sm:$0xff] %v1890_v63 }
 0x1b0   :  { %2636 = shalt.err (!%p2633_p2)
}
 0x1b1   :  { %s2637_s16 = scalar_lea.hbm %s3723_s6, 8192 }
 0x1b2   :  { %p2638_p3 = scmp.ne.s32.totalorder %s3723_s6, %s2637_s16  ;;  %p2641_p4 = scmp.lt.u32.totalorder %s2637_s16, %s3723_s6 }
 0x1b4   :  { %p2643_p5 = pnand %p2641_p4, %p2638_p3 }
 0x1b6   :  { %2646 = shalt.err (!%p2643_p5)
}
 0x1b7   :  { %1997 = dma.vmem_to_hbm [thread:$0]  %s1992_s0, 8192, %s3723_s6, [#allocation12], %s2661_s1, %s2661_s1, %s2662_s21  }
 0x1b8   :  { %2653 = dma.done.wait [#allocation4], 2048  }
 0x1b9   :  { %2654 = vsyncadd [#allocation4], 4294965248 }
 0x1ba   :  { %2655 = dma.done.wait [#allocation12], 8192  }
 0x1bb   :  { %2656 = vsyncadd [#allocation12], 4294959104 }
 0x1bc   :  { %2004 = vsyncpa [#allocation3], 1 }
 0x1bd   :  { %2005 = vsyncpa [#allocation6], 1 }
 0x1be   :  { %2006 = vsyncpa [#allocation9], 1 }
 0x1bf   :  { %2007 = vsyncpa [#allocation4], 1 }
 0x1c0   :  { %2008 = vsyncpa [#allocation12], 1 }

</bundles_post_ra>
